<compile_context>
chip_gen: v6e
topology: v6e:2x2x1
jax: 0.10.0
libtpu: 0.0.40
codegen_flags: <defaults>
</compile_context>

<pallas_src>
import functools

import jax
import jax.numpy as jnp
from jax.experimental import pallas as pl
from jax.experimental.pallas import tpu as pltpu


def _decoder_kernel(latent_ref,   # (Bp, L)    f32
                    wl2h_t_ref,   # (L, H)     f32   latent_to_hidden weight^T
                    bl2h_ref,     # (1, H)     f32
                    whh_t_ref,    # (4, H, H)  bf16  per-gate W_hh^T, order (i,f,g,o)
                    bgate_ref,    # (4, 1, H)  f32   b_ih + b_hh, order (i,f,g,o)
                    wh2o_t_ref,   # (H, Op)    f32   hidden_to_output weight^T (lane-padded)
                    bh2o_ref,     # (1, Op)    f32
                    out_ref,      # (S*Bp, Op) f32   row index = t*Bp + b
                    *, seq_len):
    Bp = latent_ref.shape[0]
    H = wl2h_t_ref.shape[1]

    # latent -> initial hidden state (one MXU matmul); c_0 = 0.
    h = jnp.dot(latent_ref[...], wl2h_t_ref[...],
                preferred_element_type=jnp.float32) + bl2h_ref[...]
    c = jnp.zeros_like(h)

    # Hoist loop-invariant gate weights and pre-broadcast biases
    # (JAX does not CSE broadcast_in_dim — never broadcast inside the loop).
    w_i, w_f, w_g, w_o = (whh_t_ref[0], whh_t_ref[1],
                          whh_t_ref[2], whh_t_ref[3])
    b_i = jnp.broadcast_to(bgate_ref[0], (Bp, H))
    b_f = jnp.broadcast_to(bgate_ref[1], (Bp, H))
    b_g = jnp.broadcast_to(bgate_ref[2], (Bp, H))
    b_o = jnp.broadcast_to(bgate_ref[3], (Bp, H))

    # Serial recurrence.  Zero decoder inputs => only the folded biases remain.
    # Fully unrolled (S is small and static).  Per-gate (H, H) dots keep each
    # gate in lanes [0, H) so the f*c / i*g / o*tanh(c) multiplies need no
    # cross-lane rotation on the dependence chain.
    # TODO(synk): for large S, switch to lax.fori_loop(..., unroll=4..8) with a
    #             dynamic_update_slice-carried history to bound code size.
    hs = []
    for _ in range(seq_len):
        hb = h.astype(jnp.bfloat16)       # bf16 MXU inputs; state stays f32
        zi = jnp.dot(hb, w_i, preferred_element_type=jnp.float32) + b_i
        zf = jnp.dot(hb, w_f, preferred_element_type=jnp.float32) + b_f
        zg = jnp.dot(hb, w_g, preferred_element_type=jnp.float32) + b_g
        zo = jnp.dot(hb, w_o, preferred_element_type=jnp.float32) + b_o
        i_g = jax.nn.sigmoid(zi)
        f_g = jax.nn.sigmoid(zf)
        o_g = jax.nn.sigmoid(zo)
        g_g = jnp.tanh(zg)
        c = f_g * c + i_g * g_g
        h = o_g * jnp.tanh(c)
        hs.append(h)

    # Deferred hidden->output projection: assemble the (sublane-granule aligned)
    # history once, one MXU matmul, one unmasked lane-dense store.
    hist = jnp.concatenate(hs, axis=0)                        # (S*Bp, H)
    y = jnp.dot(hist, wh2o_t_ref[...],
                preferred_element_type=jnp.float32) + bh2o_ref[...]
    out_ref[...] = y


def make_decoder_params(key, hidden_size, latent_length, output_size):
    """Deterministic parameter init mirroring the nn.Module __init__ shapes.

    Linears: xavier-uniform weights (as in the module) + PyTorch-default
    uniform(-1/sqrt(fan_in)) biases; LSTM tensors: uniform(-1/sqrt(H)).
    """
    k = jax.random.split(key, 8)
    H, L, O = hidden_size, latent_length, output_size

    def xavier(key, shape):
        fan_out, fan_in = shape
        bound = (6.0 / (fan_in + fan_out)) ** 0.5
        return jax.random.uniform(key, shape, jnp.float32, -bound, bound)

    def pt_lstm(key, shape):
        bound = 1.0 / (H ** 0.5)
        return jax.random.uniform(key, shape, jnp.float32, -bound, bound)

    def pt_linear_bias(key, fan_in, n):
        bound = 1.0 / (fan_in ** 0.5)
        return jax.random.uniform(key, (n,), jnp.float32, -bound, bound)

    return dict(
        w_l2h=xavier(k[0], (H, L)),               # latent_to_hidden.weight
        b_l2h=pt_linear_bias(k[1], L, H),         # latent_to_hidden.bias
        w_hh=pt_lstm(k[2], (4 * H, H)),           # LSTM weight_hh_l0 (i,f,g,o rows)
        b_ih=pt_lstm(k[3], (4 * H,)),             # LSTM bias_ih_l0
        b_hh=pt_lstm(k[4], (4 * H,)),             # LSTM bias_hh_l0
        w_h2o=xavier(k[5], (O, H)),               # hidden_to_output.weight
        b_h2o=pt_linear_bias(k[6], H, O),         # hidden_to_output.bias
    )


@functools.partial(jax.jit, static_argnames=("x_shape",))
def decoder_forward(latent, x_shape, params):
    """latent: (B, latent_length); x_shape: (B, S, ...) -> out (B, S, output_size)."""
    B, S = int(x_shape[0]), int(x_shape[1])
    H = params["w_l2h"].shape[0]
    L = params["w_l2h"].shape[1]
    O = params["w_h2o"].shape[0]

    Bp = max(8, -(-B // 8) * 8)            # pad batch to the 8-sublane granule
    Op = max(128, -(-O // 128) * 128)      # pad output to 128 lanes (unmasked vst)

    # Wrapper-side layout plumbing (none of this happens inside the kernel).
    latent_p = jnp.zeros((Bp, L), jnp.float32).at[:B].set(latent.astype(jnp.float32))
    wl2h_t = params["w_l2h"].T                                           # (L, H)
    bl2h = params["b_l2h"].reshape(1, H)                                 # (1, H)
    whh_t = jnp.transpose(params["w_hh"].reshape(4, H, H),
                          (0, 2, 1)).astype(jnp.bfloat16)                # (4, H, H)
    bgate = (params["b_ih"] + params["b_hh"]).reshape(4, 1, H)           # (4, 1, H)
    wh2o_t = jnp.zeros((H, Op), jnp.float32).at[:, :O].set(params["w_h2o"].T)
    bh2o = jnp.zeros((1, Op), jnp.float32).at[:, :O].set(params["b_h2o"].reshape(1, O))

    vmem = pl.BlockSpec(memory_space=pltpu.MemorySpace.VMEM)

    out2d = pl.pallas_call(
        functools.partial(_decoder_kernel, seq_len=S),
        out_shape=jax.ShapeDtypeStruct((S * Bp, Op), jnp.float32),
        in_specs=[vmem] * 7,
        out_specs=vmem,
        # TODO(synk): for production sizes add grid over B +
        #   compiler_params=pltpu.CompilerParams(
        #       dimension_semantics=("parallel",), vmem_limit_bytes=...).
    )(latent_p, wl2h_t, bl2h, whh_t, bgate, wh2o_t, bh2o)

    # (S*Bp, Op), row = t*Bp + b  ->  (B, S, O), batch_first.
    out = out2d.reshape(S, Bp, Op)[:, :B, :O].transpose(1, 0, 2)
    return out


if __name__ == "__main__":
    # Small shapes consistent with the module: batch=2, seq=8, hidden=32,
    # latent=16, output_size=2 (mean + log-std).
    B, S, H, L, O = 2, 8, 32, 16, 2

    key = jax.random.PRNGKey(0)
    pkey, lkey = jax.random.split(key)
    params = make_decoder_params(pkey, hidden_size=H, latent_length=L, output_size=O)
    latent = jax.random.normal(lkey, (B, L), dtype=jnp.float32)

    out = decoder_forward(latent, (B, S), params)
    out = jax.block_until_ready(out)
    assert out.shape == (B, S, O) and out.dtype == jnp.float32
    assert bool(jnp.all(jnp.isfinite(out)))
    print("KERNEL_OK")
</pallas_src>

<mosaic_0001>
module attributes {stable_mosaic.version = 11 : i64} {
  func.func @_decoder_kernel(%arg0: memref<8x16xf32, #tpu.memory_space<vmem>>, %arg1: memref<16x32xf32, #tpu.memory_space<vmem>>, %arg2: memref<1x32xf32, #tpu.memory_space<vmem>>, %arg3: memref<4x32x32xbf16, #tpu.memory_space<vmem>>, %arg4: memref<4x1x32xf32, #tpu.memory_space<vmem>>, %arg5: memref<32x128xf32, #tpu.memory_space<vmem>>, %arg6: memref<1x128xf32, #tpu.memory_space<vmem>>, %arg7: memref<64x128xf32, #tpu.memory_space<vmem>>) attributes {dimension_semantics = [], scalar_prefetch = 0 : i64, scratch_operands = 0 : i64, tpu.core_type = #tpu.core_type<tc>} {
    %c0 = arith.constant 0 : index
    %c0_0 = arith.constant 0 : index
    %0 = vector.load %arg0[%c0, %c0_0] : memref<8x16xf32, #tpu.memory_space<vmem>>, vector<8x16xf32>
    %c0_1 = arith.constant 0 : index
    %c0_2 = arith.constant 0 : index
    %1 = vector.load %arg1[%c0_1, %c0_2] : memref<16x32xf32, #tpu.memory_space<vmem>>, vector<16x32xf32>
    %cst = arith.constant dense<0.000000e+00> : vector<8x32xf32>
    %2 = tpu.matmul %0, %1, %cst {dimension_numbers = #tpu.dot_dimension_numbers<[1], [0], [0], [1], [0, 0, 1, 1], [], []>} : vector<8x16xf32>, vector<16x32xf32>, vector<8x32xf32> -> vector<8x32xf32>
    %c0_3 = arith.constant 0 : index
    %c0_4 = arith.constant 0 : index
    %3 = vector.load %arg2[%c0_3, %c0_4] : memref<1x32xf32, #tpu.memory_space<vmem>>, vector<1x32xf32>
    %4 = vector.broadcast %3 : vector<1x32xf32> to vector<8x32xf32>
    %5 = arith.addf %2, %4 : vector<8x32xf32>
    %cst_5 = arith.constant 0.000000e+00 : f32
    %6 = vector.broadcast %cst_5 : f32 to vector<8x32xf32>
    %c0_6 = arith.constant 0 : index
    %c0_7 = arith.constant 0 : index
    %c0_8 = arith.constant 0 : index
    %7 = vector.load %arg3[%c0_6, %c0_7, %c0_8] : memref<4x32x32xbf16, #tpu.memory_space<vmem>>, vector<1x32x32xbf16>
    %8 = vector.shape_cast %7 : vector<1x32x32xbf16> to vector<32x32xbf16>
    %c1 = arith.constant 1 : index
    %c0_9 = arith.constant 0 : index
    %c0_10 = arith.constant 0 : index
    %9 = vector.load %arg3[%c1, %c0_9, %c0_10] : memref<4x32x32xbf16, #tpu.memory_space<vmem>>, vector<1x32x32xbf16>
    %10 = vector.shape_cast %9 : vector<1x32x32xbf16> to vector<32x32xbf16>
    %c2 = arith.constant 2 : index
    %c0_11 = arith.constant 0 : index
    %c0_12 = arith.constant 0 : index
    %11 = vector.load %arg3[%c2, %c0_11, %c0_12] : memref<4x32x32xbf16, #tpu.memory_space<vmem>>, vector<1x32x32xbf16>
    %12 = vector.shape_cast %11 : vector<1x32x32xbf16> to vector<32x32xbf16>
    %c3 = arith.constant 3 : index
    %c0_13 = arith.constant 0 : index
    %c0_14 = arith.constant 0 : index
    %13 = vector.load %arg3[%c3, %c0_13, %c0_14] : memref<4x32x32xbf16, #tpu.memory_space<vmem>>, vector<1x32x32xbf16>
    %14 = vector.shape_cast %13 : vector<1x32x32xbf16> to vector<32x32xbf16>
    %c0_15 = arith.constant 0 : index
    %c0_16 = arith.constant 0 : index
    %c0_17 = arith.constant 0 : index
    %15 = vector.load %arg4[%c0_15, %c0_16, %c0_17] : memref<4x1x32xf32, #tpu.memory_space<vmem>>, vector<1x1x32xf32>
    %16 = vector.shape_cast %15 : vector<1x1x32xf32> to vector<1x32xf32>
    %17 = vector.shape_cast %16 : vector<1x32xf32> to vector<1x32xf32>
    %18 = vector.broadcast %17 : vector<1x32xf32> to vector<8x32xf32>
    %c1_18 = arith.constant 1 : index
    %c0_19 = arith.constant 0 : index
    %c0_20 = arith.constant 0 : index
    %19 = vector.load %arg4[%c1_18, %c0_19, %c0_20] : memref<4x1x32xf32, #tpu.memory_space<vmem>>, vector<1x1x32xf32>
    %20 = vector.shape_cast %19 : vector<1x1x32xf32> to vector<1x32xf32>
    %21 = vector.shape_cast %20 : vector<1x32xf32> to vector<1x32xf32>
    %22 = vector.broadcast %21 : vector<1x32xf32> to vector<8x32xf32>
    %c2_21 = arith.constant 2 : index
    %c0_22 = arith.constant 0 : index
    %c0_23 = arith.constant 0 : index
    %23 = vector.load %arg4[%c2_21, %c0_22, %c0_23] : memref<4x1x32xf32, #tpu.memory_space<vmem>>, vector<1x1x32xf32>
    %24 = vector.shape_cast %23 : vector<1x1x32xf32> to vector<1x32xf32>
    %25 = vector.shape_cast %24 : vector<1x32xf32> to vector<1x32xf32>
    %26 = vector.broadcast %25 : vector<1x32xf32> to vector<8x32xf32>
    %c3_24 = arith.constant 3 : index
    %c0_25 = arith.constant 0 : index
    %c0_26 = arith.constant 0 : index
    %27 = vector.load %arg4[%c3_24, %c0_25, %c0_26] : memref<4x1x32xf32, #tpu.memory_space<vmem>>, vector<1x1x32xf32>
    %28 = vector.shape_cast %27 : vector<1x1x32xf32> to vector<1x32xf32>
    %29 = vector.shape_cast %28 : vector<1x32xf32> to vector<1x32xf32>
    %30 = vector.broadcast %29 : vector<1x32xf32> to vector<8x32xf32>
    %31 = arith.truncf %5 : vector<8x32xf32> to vector<8x32xbf16>
    %cst_27 = arith.constant dense<0.000000e+00> : vector<8x32xf32>
    %32 = tpu.matmul %31, %8, %cst_27 {dimension_numbers = #tpu.dot_dimension_numbers<[1], [0], [0], [1], [0, 0, 1, 1], [], []>} : vector<8x32xbf16>, vector<32x32xbf16>, vector<8x32xf32> -> vector<8x32xf32>
    %33 = arith.addf %32, %18 : vector<8x32xf32>
    %cst_28 = arith.constant dense<0.000000e+00> : vector<8x32xf32>
    %34 = tpu.matmul %31, %10, %cst_28 {dimension_numbers = #tpu.dot_dimension_numbers<[1], [0], [0], [1], [0, 0, 1, 1], [], []>} : vector<8x32xbf16>, vector<32x32xbf16>, vector<8x32xf32> -> vector<8x32xf32>
    %35 = arith.addf %34, %22 : vector<8x32xf32>
    %cst_29 = arith.constant dense<0.000000e+00> : vector<8x32xf32>
    %36 = tpu.matmul %31, %12, %cst_29 {dimension_numbers = #tpu.dot_dimension_numbers<[1], [0], [0], [1], [0, 0, 1, 1], [], []>} : vector<8x32xbf16>, vector<32x32xbf16>, vector<8x32xf32> -> vector<8x32xf32>
    %37 = arith.addf %36, %26 : vector<8x32xf32>
    %cst_30 = arith.constant dense<0.000000e+00> : vector<8x32xf32>
    %38 = tpu.matmul %31, %14, %cst_30 {dimension_numbers = #tpu.dot_dimension_numbers<[1], [0], [0], [1], [0, 0, 1, 1], [], []>} : vector<8x32xbf16>, vector<32x32xbf16>, vector<8x32xf32> -> vector<8x32xf32>
    %39 = arith.addf %38, %30 : vector<8x32xf32>
    %40 = arith.negf %33 : vector<8x32xf32>
    %41 = math.exp %40 : vector<8x32xf32>
    %cst_31 = arith.constant 1.000000e+00 : f32
    %42 = vector.broadcast %cst_31 : f32 to vector<8x32xf32>
    %43 = arith.addf %42, %41 : vector<8x32xf32>
    %44 = arith.divf %42, %43 : vector<8x32xf32>
    %45 = arith.negf %35 : vector<8x32xf32>
    %46 = math.exp %45 : vector<8x32xf32>
    %cst_32 = arith.constant 1.000000e+00 : f32
    %47 = vector.broadcast %cst_32 : f32 to vector<8x32xf32>
    %48 = arith.addf %47, %46 : vector<8x32xf32>
    %49 = arith.divf %47, %48 : vector<8x32xf32>
    %50 = arith.negf %39 : vector<8x32xf32>
    %51 = math.exp %50 : vector<8x32xf32>
    %cst_33 = arith.constant 1.000000e+00 : f32
    %52 = vector.broadcast %cst_33 : f32 to vector<8x32xf32>
    %53 = arith.addf %52, %51 : vector<8x32xf32>
    %54 = arith.divf %52, %53 : vector<8x32xf32>
    %55 = math.tanh %37 : vector<8x32xf32>
    %56 = arith.mulf %49, %6 : vector<8x32xf32>
    %57 = arith.mulf %44, %55 : vector<8x32xf32>
    %58 = arith.addf %56, %57 : vector<8x32xf32>
    %59 = math.tanh %58 : vector<8x32xf32>
    %60 = arith.mulf %54, %59 : vector<8x32xf32>
    %61 = arith.truncf %60 : vector<8x32xf32> to vector<8x32xbf16>
    %cst_34 = arith.constant dense<0.000000e+00> : vector<8x32xf32>
    %62 = tpu.matmul %61, %8, %cst_34 {dimension_numbers = #tpu.dot_dimension_numbers<[1], [0], [0], [1], [0, 0, 1, 1], [], []>} : vector<8x32xbf16>, vector<32x32xbf16>, vector<8x32xf32> -> vector<8x32xf32>
    %63 = arith.addf %62, %18 : vector<8x32xf32>
    %cst_35 = arith.constant dense<0.000000e+00> : vector<8x32xf32>
    %64 = tpu.matmul %61, %10, %cst_35 {dimension_numbers = #tpu.dot_dimension_numbers<[1], [0], [0], [1], [0, 0, 1, 1], [], []>} : vector<8x32xbf16>, vector<32x32xbf16>, vector<8x32xf32> -> vector<8x32xf32>
    %65 = arith.addf %64, %22 : vector<8x32xf32>
    %cst_36 = arith.constant dense<0.000000e+00> : vector<8x32xf32>
    %66 = tpu.matmul %61, %12, %cst_36 {dimension_numbers = #tpu.dot_dimension_numbers<[1], [0], [0], [1], [0, 0, 1, 1], [], []>} : vector<8x32xbf16>, vector<32x32xbf16>, vector<8x32xf32> -> vector<8x32xf32>
    %67 = arith.addf %66, %26 : vector<8x32xf32>
    %cst_37 = arith.constant dense<0.000000e+00> : vector<8x32xf32>
    %68 = tpu.matmul %61, %14, %cst_37 {dimension_numbers = #tpu.dot_dimension_numbers<[1], [0], [0], [1], [0, 0, 1, 1], [], []>} : vector<8x32xbf16>, vector<32x32xbf16>, vector<8x32xf32> -> vector<8x32xf32>
    %69 = arith.addf %68, %30 : vector<8x32xf32>
    %70 = arith.negf %63 : vector<8x32xf32>
    %71 = math.exp %70 : vector<8x32xf32>
    %cst_38 = arith.constant 1.000000e+00 : f32
    %72 = vector.broadcast %cst_38 : f32 to vector<8x32xf32>
    %73 = arith.addf %72, %71 : vector<8x32xf32>
    %74 = arith.divf %72, %73 : vector<8x32xf32>
    %75 = arith.negf %65 : vector<8x32xf32>
    %76 = math.exp %75 : vector<8x32xf32>
    %cst_39 = arith.constant 1.000000e+00 : f32
    %77 = vector.broadcast %cst_39 : f32 to vector<8x32xf32>
    %78 = arith.addf %77, %76 : vector<8x32xf32>
    %79 = arith.divf %77, %78 : vector<8x32xf32>
    %80 = arith.negf %69 : vector<8x32xf32>
    %81 = math.exp %80 : vector<8x32xf32>
    %cst_40 = arith.constant 1.000000e+00 : f32
    %82 = vector.broadcast %cst_40 : f32 to vector<8x32xf32>
    %83 = arith.addf %82, %81 : vector<8x32xf32>
    %84 = arith.divf %82, %83 : vector<8x32xf32>
    %85 = math.tanh %67 : vector<8x32xf32>
    %86 = arith.mulf %79, %58 : vector<8x32xf32>
    %87 = arith.mulf %74, %85 : vector<8x32xf32>
    %88 = arith.addf %86, %87 : vector<8x32xf32>
    %89 = math.tanh %88 : vector<8x32xf32>
    %90 = arith.mulf %84, %89 : vector<8x32xf32>
    %91 = arith.truncf %90 : vector<8x32xf32> to vector<8x32xbf16>
    %cst_41 = arith.constant dense<0.000000e+00> : vector<8x32xf32>
    %92 = tpu.matmul %91, %8, %cst_41 {dimension_numbers = #tpu.dot_dimension_numbers<[1], [0], [0], [1], [0, 0, 1, 1], [], []>} : vector<8x32xbf16>, vector<32x32xbf16>, vector<8x32xf32> -> vector<8x32xf32>
    %93 = arith.addf %92, %18 : vector<8x32xf32>
    %cst_42 = arith.constant dense<0.000000e+00> : vector<8x32xf32>
    %94 = tpu.matmul %91, %10, %cst_42 {dimension_numbers = #tpu.dot_dimension_numbers<[1], [0], [0], [1], [0, 0, 1, 1], [], []>} : vector<8x32xbf16>, vector<32x32xbf16>, vector<8x32xf32> -> vector<8x32xf32>
    %95 = arith.addf %94, %22 : vector<8x32xf32>
    %cst_43 = arith.constant dense<0.000000e+00> : vector<8x32xf32>
    %96 = tpu.matmul %91, %12, %cst_43 {dimension_numbers = #tpu.dot_dimension_numbers<[1], [0], [0], [1], [0, 0, 1, 1], [], []>} : vector<8x32xbf16>, vector<32x32xbf16>, vector<8x32xf32> -> vector<8x32xf32>
    %97 = arith.addf %96, %26 : vector<8x32xf32>
    %cst_44 = arith.constant dense<0.000000e+00> : vector<8x32xf32>
    %98 = tpu.matmul %91, %14, %cst_44 {dimension_numbers = #tpu.dot_dimension_numbers<[1], [0], [0], [1], [0, 0, 1, 1], [], []>} : vector<8x32xbf16>, vector<32x32xbf16>, vector<8x32xf32> -> vector<8x32xf32>
    %99 = arith.addf %98, %30 : vector<8x32xf32>
    %100 = arith.negf %93 : vector<8x32xf32>
    %101 = math.exp %100 : vector<8x32xf32>
    %cst_45 = arith.constant 1.000000e+00 : f32
    %102 = vector.broadcast %cst_45 : f32 to vector<8x32xf32>
    %103 = arith.addf %102, %101 : vector<8x32xf32>
    %104 = arith.divf %102, %103 : vector<8x32xf32>
    %105 = arith.negf %95 : vector<8x32xf32>
    %106 = math.exp %105 : vector<8x32xf32>
    %cst_46 = arith.constant 1.000000e+00 : f32
    %107 = vector.broadcast %cst_46 : f32 to vector<8x32xf32>
    %108 = arith.addf %107, %106 : vector<8x32xf32>
    %109 = arith.divf %107, %108 : vector<8x32xf32>
    %110 = arith.negf %99 : vector<8x32xf32>
    %111 = math.exp %110 : vector<8x32xf32>
    %cst_47 = arith.constant 1.000000e+00 : f32
    %112 = vector.broadcast %cst_47 : f32 to vector<8x32xf32>
    %113 = arith.addf %112, %111 : vector<8x32xf32>
    %114 = arith.divf %112, %113 : vector<8x32xf32>
    %115 = math.tanh %97 : vector<8x32xf32>
    %116 = arith.mulf %109, %88 : vector<8x32xf32>
    %117 = arith.mulf %104, %115 : vector<8x32xf32>
    %118 = arith.addf %116, %117 : vector<8x32xf32>
    %119 = math.tanh %118 : vector<8x32xf32>
    %120 = arith.mulf %114, %119 : vector<8x32xf32>
    %121 = arith.truncf %120 : vector<8x32xf32> to vector<8x32xbf16>
    %cst_48 = arith.constant dense<0.000000e+00> : vector<8x32xf32>
    %122 = tpu.matmul %121, %8, %cst_48 {dimension_numbers = #tpu.dot_dimension_numbers<[1], [0], [0], [1], [0, 0, 1, 1], [], []>} : vector<8x32xbf16>, vector<32x32xbf16>, vector<8x32xf32> -> vector<8x32xf32>
    %123 = arith.addf %122, %18 : vector<8x32xf32>
    %cst_49 = arith.constant dense<0.000000e+00> : vector<8x32xf32>
    %124 = tpu.matmul %121, %10, %cst_49 {dimension_numbers = #tpu.dot_dimension_numbers<[1], [0], [0], [1], [0, 0, 1, 1], [], []>} : vector<8x32xbf16>, vector<32x32xbf16>, vector<8x32xf32> -> vector<8x32xf32>
    %125 = arith.addf %124, %22 : vector<8x32xf32>
    %cst_50 = arith.constant dense<0.000000e+00> : vector<8x32xf32>
    %126 = tpu.matmul %121, %12, %cst_50 {dimension_numbers = #tpu.dot_dimension_numbers<[1], [0], [0], [1], [0, 0, 1, 1], [], []>} : vector<8x32xbf16>, vector<32x32xbf16>, vector<8x32xf32> -> vector<8x32xf32>
    %127 = arith.addf %126, %26 : vector<8x32xf32>
    %cst_51 = arith.constant dense<0.000000e+00> : vector<8x32xf32>
    %128 = tpu.matmul %121, %14, %cst_51 {dimension_numbers = #tpu.dot_dimension_numbers<[1], [0], [0], [1], [0, 0, 1, 1], [], []>} : vector<8x32xbf16>, vector<32x32xbf16>, vector<8x32xf32> -> vector<8x32xf32>
    %129 = arith.addf %128, %30 : vector<8x32xf32>
    %130 = arith.negf %123 : vector<8x32xf32>
    %131 = math.exp %130 : vector<8x32xf32>
    %cst_52 = arith.constant 1.000000e+00 : f32
    %132 = vector.broadcast %cst_52 : f32 to vector<8x32xf32>
    %133 = arith.addf %132, %131 : vector<8x32xf32>
    %134 = arith.divf %132, %133 : vector<8x32xf32>
    %135 = arith.negf %125 : vector<8x32xf32>
    %136 = math.exp %135 : vector<8x32xf32>
    %cst_53 = arith.constant 1.000000e+00 : f32
    %137 = vector.broadcast %cst_53 : f32 to vector<8x32xf32>
    %138 = arith.addf %137, %136 : vector<8x32xf32>
    %139 = arith.divf %137, %138 : vector<8x32xf32>
    %140 = arith.negf %129 : vector<8x32xf32>
    %141 = math.exp %140 : vector<8x32xf32>
    %cst_54 = arith.constant 1.000000e+00 : f32
    %142 = vector.broadcast %cst_54 : f32 to vector<8x32xf32>
    %143 = arith.addf %142, %141 : vector<8x32xf32>
    %144 = arith.divf %142, %143 : vector<8x32xf32>
    %145 = math.tanh %127 : vector<8x32xf32>
    %146 = arith.mulf %139, %118 : vector<8x32xf32>
    %147 = arith.mulf %134, %145 : vector<8x32xf32>
    %148 = arith.addf %146, %147 : vector<8x32xf32>
    %149 = math.tanh %148 : vector<8x32xf32>
    %150 = arith.mulf %144, %149 : vector<8x32xf32>
    %151 = arith.truncf %150 : vector<8x32xf32> to vector<8x32xbf16>
    %cst_55 = arith.constant dense<0.000000e+00> : vector<8x32xf32>
    %152 = tpu.matmul %151, %8, %cst_55 {dimension_numbers = #tpu.dot_dimension_numbers<[1], [0], [0], [1], [0, 0, 1, 1], [], []>} : vector<8x32xbf16>, vector<32x32xbf16>, vector<8x32xf32> -> vector<8x32xf32>
    %153 = arith.addf %152, %18 : vector<8x32xf32>
    %cst_56 = arith.constant dense<0.000000e+00> : vector<8x32xf32>
    %154 = tpu.matmul %151, %10, %cst_56 {dimension_numbers = #tpu.dot_dimension_numbers<[1], [0], [0], [1], [0, 0, 1, 1], [], []>} : vector<8x32xbf16>, vector<32x32xbf16>, vector<8x32xf32> -> vector<8x32xf32>
    %155 = arith.addf %154, %22 : vector<8x32xf32>
    %cst_57 = arith.constant dense<0.000000e+00> : vector<8x32xf32>
    %156 = tpu.matmul %151, %12, %cst_57 {dimension_numbers = #tpu.dot_dimension_numbers<[1], [0], [0], [1], [0, 0, 1, 1], [], []>} : vector<8x32xbf16>, vector<32x32xbf16>, vector<8x32xf32> -> vector<8x32xf32>
    %157 = arith.addf %156, %26 : vector<8x32xf32>
    %cst_58 = arith.constant dense<0.000000e+00> : vector<8x32xf32>
    %158 = tpu.matmul %151, %14, %cst_58 {dimension_numbers = #tpu.dot_dimension_numbers<[1], [0], [0], [1], [0, 0, 1, 1], [], []>} : vector<8x32xbf16>, vector<32x32xbf16>, vector<8x32xf32> -> vector<8x32xf32>
    %159 = arith.addf %158, %30 : vector<8x32xf32>
    %160 = arith.negf %153 : vector<8x32xf32>
    %161 = math.exp %160 : vector<8x32xf32>
    %cst_59 = arith.constant 1.000000e+00 : f32
    %162 = vector.broadcast %cst_59 : f32 to vector<8x32xf32>
    %163 = arith.addf %162, %161 : vector<8x32xf32>
    %164 = arith.divf %162, %163 : vector<8x32xf32>
    %165 = arith.negf %155 : vector<8x32xf32>
    %166 = math.exp %165 : vector<8x32xf32>
    %cst_60 = arith.constant 1.000000e+00 : f32
    %167 = vector.broadcast %cst_60 : f32 to vector<8x32xf32>
    %168 = arith.addf %167, %166 : vector<8x32xf32>
    %169 = arith.divf %167, %168 : vector<8x32xf32>
    %170 = arith.negf %159 : vector<8x32xf32>
    %171 = math.exp %170 : vector<8x32xf32>
    %cst_61 = arith.constant 1.000000e+00 : f32
    %172 = vector.broadcast %cst_61 : f32 to vector<8x32xf32>
    %173 = arith.addf %172, %171 : vector<8x32xf32>
    %174 = arith.divf %172, %173 : vector<8x32xf32>
    %175 = math.tanh %157 : vector<8x32xf32>
    %176 = arith.mulf %169, %148 : vector<8x32xf32>
    %177 = arith.mulf %164, %175 : vector<8x32xf32>
    %178 = arith.addf %176, %177 : vector<8x32xf32>
    %179 = math.tanh %178 : vector<8x32xf32>
    %180 = arith.mulf %174, %179 : vector<8x32xf32>
    %181 = arith.truncf %180 : vector<8x32xf32> to vector<8x32xbf16>
    %cst_62 = arith.constant dense<0.000000e+00> : vector<8x32xf32>
    %182 = tpu.matmul %181, %8, %cst_62 {dimension_numbers = #tpu.dot_dimension_numbers<[1], [0], [0], [1], [0, 0, 1, 1], [], []>} : vector<8x32xbf16>, vector<32x32xbf16>, vector<8x32xf32> -> vector<8x32xf32>
    %183 = arith.addf %182, %18 : vector<8x32xf32>
    %cst_63 = arith.constant dense<0.000000e+00> : vector<8x32xf32>
    %184 = tpu.matmul %181, %10, %cst_63 {dimension_numbers = #tpu.dot_dimension_numbers<[1], [0], [0], [1], [0, 0, 1, 1], [], []>} : vector<8x32xbf16>, vector<32x32xbf16>, vector<8x32xf32> -> vector<8x32xf32>
    %185 = arith.addf %184, %22 : vector<8x32xf32>
    %cst_64 = arith.constant dense<0.000000e+00> : vector<8x32xf32>
    %186 = tpu.matmul %181, %12, %cst_64 {dimension_numbers = #tpu.dot_dimension_numbers<[1], [0], [0], [1], [0, 0, 1, 1], [], []>} : vector<8x32xbf16>, vector<32x32xbf16>, vector<8x32xf32> -> vector<8x32xf32>
    %187 = arith.addf %186, %26 : vector<8x32xf32>
    %cst_65 = arith.constant dense<0.000000e+00> : vector<8x32xf32>
    %188 = tpu.matmul %181, %14, %cst_65 {dimension_numbers = #tpu.dot_dimension_numbers<[1], [0], [0], [1], [0, 0, 1, 1], [], []>} : vector<8x32xbf16>, vector<32x32xbf16>, vector<8x32xf32> -> vector<8x32xf32>
    %189 = arith.addf %188, %30 : vector<8x32xf32>
    %190 = arith.negf %183 : vector<8x32xf32>
    %191 = math.exp %190 : vector<8x32xf32>
    %cst_66 = arith.constant 1.000000e+00 : f32
    %192 = vector.broadcast %cst_66 : f32 to vector<8x32xf32>
    %193 = arith.addf %192, %191 : vector<8x32xf32>
    %194 = arith.divf %192, %193 : vector<8x32xf32>
    %195 = arith.negf %185 : vector<8x32xf32>
    %196 = math.exp %195 : vector<8x32xf32>
    %cst_67 = arith.constant 1.000000e+00 : f32
    %197 = vector.broadcast %cst_67 : f32 to vector<8x32xf32>
    %198 = arith.addf %197, %196 : vector<8x32xf32>
    %199 = arith.divf %197, %198 : vector<8x32xf32>
    %200 = arith.negf %189 : vector<8x32xf32>
    %201 = math.exp %200 : vector<8x32xf32>
    %cst_68 = arith.constant 1.000000e+00 : f32
    %202 = vector.broadcast %cst_68 : f32 to vector<8x32xf32>
    %203 = arith.addf %202, %201 : vector<8x32xf32>
    %204 = arith.divf %202, %203 : vector<8x32xf32>
    %205 = math.tanh %187 : vector<8x32xf32>
    %206 = arith.mulf %199, %178 : vector<8x32xf32>
    %207 = arith.mulf %194, %205 : vector<8x32xf32>
    %208 = arith.addf %206, %207 : vector<8x32xf32>
    %209 = math.tanh %208 : vector<8x32xf32>
    %210 = arith.mulf %204, %209 : vector<8x32xf32>
    %211 = arith.truncf %210 : vector<8x32xf32> to vector<8x32xbf16>
    %cst_69 = arith.constant dense<0.000000e+00> : vector<8x32xf32>
    %212 = tpu.matmul %211, %8, %cst_69 {dimension_numbers = #tpu.dot_dimension_numbers<[1], [0], [0], [1], [0, 0, 1, 1], [], []>} : vector<8x32xbf16>, vector<32x32xbf16>, vector<8x32xf32> -> vector<8x32xf32>
    %213 = arith.addf %212, %18 : vector<8x32xf32>
    %cst_70 = arith.constant dense<0.000000e+00> : vector<8x32xf32>
    %214 = tpu.matmul %211, %10, %cst_70 {dimension_numbers = #tpu.dot_dimension_numbers<[1], [0], [0], [1], [0, 0, 1, 1], [], []>} : vector<8x32xbf16>, vector<32x32xbf16>, vector<8x32xf32> -> vector<8x32xf32>
    %215 = arith.addf %214, %22 : vector<8x32xf32>
    %cst_71 = arith.constant dense<0.000000e+00> : vector<8x32xf32>
    %216 = tpu.matmul %211, %12, %cst_71 {dimension_numbers = #tpu.dot_dimension_numbers<[1], [0], [0], [1], [0, 0, 1, 1], [], []>} : vector<8x32xbf16>, vector<32x32xbf16>, vector<8x32xf32> -> vector<8x32xf32>
    %217 = arith.addf %216, %26 : vector<8x32xf32>
    %cst_72 = arith.constant dense<0.000000e+00> : vector<8x32xf32>
    %218 = tpu.matmul %211, %14, %cst_72 {dimension_numbers = #tpu.dot_dimension_numbers<[1], [0], [0], [1], [0, 0, 1, 1], [], []>} : vector<8x32xbf16>, vector<32x32xbf16>, vector<8x32xf32> -> vector<8x32xf32>
    %219 = arith.addf %218, %30 : vector<8x32xf32>
    %220 = arith.negf %213 : vector<8x32xf32>
    %221 = math.exp %220 : vector<8x32xf32>
    %cst_73 = arith.constant 1.000000e+00 : f32
    %222 = vector.broadcast %cst_73 : f32 to vector<8x32xf32>
    %223 = arith.addf %222, %221 : vector<8x32xf32>
    %224 = arith.divf %222, %223 : vector<8x32xf32>
    %225 = arith.negf %215 : vector<8x32xf32>
    %226 = math.exp %225 : vector<8x32xf32>
    %cst_74 = arith.constant 1.000000e+00 : f32
    %227 = vector.broadcast %cst_74 : f32 to vector<8x32xf32>
    %228 = arith.addf %227, %226 : vector<8x32xf32>
    %229 = arith.divf %227, %228 : vector<8x32xf32>
    %230 = arith.negf %219 : vector<8x32xf32>
    %231 = math.exp %230 : vector<8x32xf32>
    %cst_75 = arith.constant 1.000000e+00 : f32
    %232 = vector.broadcast %cst_75 : f32 to vector<8x32xf32>
    %233 = arith.addf %232, %231 : vector<8x32xf32>
    %234 = arith.divf %232, %233 : vector<8x32xf32>
    %235 = math.tanh %217 : vector<8x32xf32>
    %236 = arith.mulf %229, %208 : vector<8x32xf32>
    %237 = arith.mulf %224, %235 : vector<8x32xf32>
    %238 = arith.addf %236, %237 : vector<8x32xf32>
    %239 = math.tanh %238 : vector<8x32xf32>
    %240 = arith.mulf %234, %239 : vector<8x32xf32>
    %241 = arith.truncf %240 : vector<8x32xf32> to vector<8x32xbf16>
    %cst_76 = arith.constant dense<0.000000e+00> : vector<8x32xf32>
    %242 = tpu.matmul %241, %8, %cst_76 {dimension_numbers = #tpu.dot_dimension_numbers<[1], [0], [0], [1], [0, 0, 1, 1], [], []>} : vector<8x32xbf16>, vector<32x32xbf16>, vector<8x32xf32> -> vector<8x32xf32>
    %243 = arith.addf %242, %18 : vector<8x32xf32>
    %cst_77 = arith.constant dense<0.000000e+00> : vector<8x32xf32>
    %244 = tpu.matmul %241, %10, %cst_77 {dimension_numbers = #tpu.dot_dimension_numbers<[1], [0], [0], [1], [0, 0, 1, 1], [], []>} : vector<8x32xbf16>, vector<32x32xbf16>, vector<8x32xf32> -> vector<8x32xf32>
    %245 = arith.addf %244, %22 : vector<8x32xf32>
    %cst_78 = arith.constant dense<0.000000e+00> : vector<8x32xf32>
    %246 = tpu.matmul %241, %12, %cst_78 {dimension_numbers = #tpu.dot_dimension_numbers<[1], [0], [0], [1], [0, 0, 1, 1], [], []>} : vector<8x32xbf16>, vector<32x32xbf16>, vector<8x32xf32> -> vector<8x32xf32>
    %247 = arith.addf %246, %26 : vector<8x32xf32>
    %cst_79 = arith.constant dense<0.000000e+00> : vector<8x32xf32>
    %248 = tpu.matmul %241, %14, %cst_79 {dimension_numbers = #tpu.dot_dimension_numbers<[1], [0], [0], [1], [0, 0, 1, 1], [], []>} : vector<8x32xbf16>, vector<32x32xbf16>, vector<8x32xf32> -> vector<8x32xf32>
    %249 = arith.addf %248, %30 : vector<8x32xf32>
    %250 = arith.negf %243 : vector<8x32xf32>
    %251 = math.exp %250 : vector<8x32xf32>
    %cst_80 = arith.constant 1.000000e+00 : f32
    %252 = vector.broadcast %cst_80 : f32 to vector<8x32xf32>
    %253 = arith.addf %252, %251 : vector<8x32xf32>
    %254 = arith.divf %252, %253 : vector<8x32xf32>
    %255 = arith.negf %245 : vector<8x32xf32>
    %256 = math.exp %255 : vector<8x32xf32>
    %cst_81 = arith.constant 1.000000e+00 : f32
    %257 = vector.broadcast %cst_81 : f32 to vector<8x32xf32>
    %258 = arith.addf %257, %256 : vector<8x32xf32>
    %259 = arith.divf %257, %258 : vector<8x32xf32>
    %260 = arith.negf %249 : vector<8x32xf32>
    %261 = math.exp %260 : vector<8x32xf32>
    %cst_82 = arith.constant 1.000000e+00 : f32
    %262 = vector.broadcast %cst_82 : f32 to vector<8x32xf32>
    %263 = arith.addf %262, %261 : vector<8x32xf32>
    %264 = arith.divf %262, %263 : vector<8x32xf32>
    %265 = math.tanh %247 : vector<8x32xf32>
    %266 = arith.mulf %259, %238 : vector<8x32xf32>
    %267 = arith.mulf %254, %265 : vector<8x32xf32>
    %268 = arith.addf %266, %267 : vector<8x32xf32>
    %269 = math.tanh %268 : vector<8x32xf32>
    %270 = arith.mulf %264, %269 : vector<8x32xf32>
    %271 = tpu.concatenate %60, %90, %120, %150, %180, %210, %240, %270 in 0 : vector<8x32xf32>, vector<8x32xf32>, vector<8x32xf32>, vector<8x32xf32>, vector<8x32xf32>, vector<8x32xf32>, vector<8x32xf32>, vector<8x32xf32> -> vector<64x32xf32>
    %c0_83 = arith.constant 0 : index
    %c0_84 = arith.constant 0 : index
    %272 = vector.load %arg5[%c0_83, %c0_84] : memref<32x128xf32, #tpu.memory_space<vmem>>, vector<32x128xf32>
    %cst_85 = arith.constant dense<0.000000e+00> : vector<64x128xf32>
    %273 = tpu.matmul %271, %272, %cst_85 {dimension_numbers = #tpu.dot_dimension_numbers<[1], [0], [0], [1], [0, 0, 1, 1], [], []>} : vector<64x32xf32>, vector<32x128xf32>, vector<64x128xf32> -> vector<64x128xf32>
    %c0_86 = arith.constant 0 : index
    %c0_87 = arith.constant 0 : index
    %274 = vector.load %arg6[%c0_86, %c0_87] : memref<1x128xf32, #tpu.memory_space<vmem>>, vector<1x128xf32>
    %275 = vector.broadcast %274 : vector<1x128xf32> to vector<64x128xf32>
    %276 = arith.addf %273, %275 : vector<64x128xf32>
    %c0_88 = arith.constant 0 : index
    %c0_89 = arith.constant 0 : index
    %277 = vector.load %arg7[%c0_88, %c0_89] : memref<64x128xf32, #tpu.memory_space<vmem>>, vector<64x128xf32>
    tpu.vector_store %arg7[%c0_88, %c0_89], %276 {strides = array<i32>} : memref<64x128xf32, #tpu.memory_space<vmem>>, vector<64x128xf32>,
    return
  }
}

</mosaic_0001>

<bundles_post_ra>
// kernel: decoder_forward.1
= control target key start
LH: loop header
LB: loop body
LE: loop exit
PB: predicated region body
PF: predicated region fallthrough
CT: control target
= control target key end

     0   :  { %v2494_v0 = vmov 0.0   ;;  %vm2495_vm0 = vmmov 0   ;;  %vm37_vm1 = vcmask 130048   ;;  %vm174_vm2 = vcmask 261120   ;;  %s2977_s1 = inlined_call_operand.vmem [shape: f32[16,32], index: 1, kind: input, shape index: {}]   ;;  %s2978_s0 = inlined_call_operand.vmem [shape: f32[8,16], index: 0, kind: input, shape index: {}]   ;;  %s2979_s3 = inlined_call_operand.vmem [shape: bf16[4,32,32], index: 3, kind: input, shape index: {}]   ;;  %s2980_s2 = inlined_call_operand.vmem [shape: f32[1,32], index: 2, kind: input, shape index: {}]   ;;  %s2981_s4 = inlined_call_operand.vmem [shape: f32[4,1,32], index: 4, kind: input, shape index: {}]   ;;  %s2982_s5 = inlined_call_operand.vmem [shape: f32[32,128], index: 5, kind: input, shape index: {}]   ;;  %s2983_s6 = inlined_call_operand.vmem [shape: f32[1,128], index: 6, kind: input, shape index: {}]   ;;  %s2984_s7 = inlined_call_operand.vmem [shape: f32[64,128], index: 7, kind: output, shape index: {}]  }
   0x1   :  { %2071 = vmatprep.subr.mxu0 %v2494_v0  ;;  %v29_v1 = vld [vmem:[%s2977_s1 + $0x8] sm:$0xff]  ;;  %v28_v2 = vld [vmem:[%s2977_s1] sm:$0xff]  ;;  %2075 = vmatprep.mubr.msk.f32.mxu0 %vm2495_vm0, %v2494_v0  ;;  %v2589_v12 = vld [vmem:[%s2979_s3 + $0x18] sm:$0xff]  }
   0x2   :  { %v27_v3 = vld [vmem:[%s2978_s0] sm:$0xff]  ;;  %2072 = vmatpush3.msra.mxu0 %v29_v1  ;;  %v2551_v4 = vld [vmem:[%s2979_s3 + $0x8] sm:$0xff]   ;;  %2094 = vmatprep.subr.bf16.mxu1 %v2494_v0  ;;  %v2597_v14 = vld [vmem:[%s2979_s3 + $0x10] sm:$0xff]  }
   0x3   :  { %2073 = vmatprep.subr.mxu0 %v2494_v0  ;;  %v2558_v5 = vld [vmem:[%s2979_s3 + $0x28] sm:$0xff]   ;;  %2098 = vmatprep.mubr.msk.bf16.mxu1 %vm2495_vm0, %v2494_v0  ;;  %v2572_v6 = vld [vmem:[%s2979_s3] sm:$0xff]   ;;  %v2610_v15 = vld [vmem:[%s2979_s3 + $0x38] sm:$0xff]  }
   0x4   :  { %2074 = vmatpush3.msra.mxu0 %v28_v2  ;;  %2095 = vmatpush3.bf16.msra.mxu1 %v2558_v5  ;;  %v2577_v7 = vld [vmem:[%s2979_s3 + $0x20] sm:$0xff]   ;;  %v2620_v16 = vld [vmem:[%s2979_s3 + $0x30] sm:$0xff]  }
   0x5   :  { %2076 = vmatmul.mubr.msk.f32.vlgmr.msra.gmra.mxu0 %vm37_vm1, %v27_v3  ;;  %2078 = vmatprep.subr.bf16.mxu0 %v2494_v0  ;;  %v1866_v8 = vld [vmem:[%s2980_s2] ss:$0 sm:$0xff]  ;;  %v2643_v28 = vld [vmem:[%s2981_s4 + $0x1] ss:$0 sm:$0xff]  ;;  %v2649_v35 = vld [vmem:[%s2981_s4 + $0x3] ss:$0 sm:$0xff] }
   0x6   :  { %2079 = vmatpush3.bf16.msra.mxu0 %v2551_v4  ;;  %2096 = vmatprep.subr.bf16.mxu1 %v2494_v0  ;;  %v2637_v17 = vld [vmem:[%s2981_s4] ss:$0 sm:$0xff]  ;;  %v2655_v41 = vld [vmem:[%s2981_s4 + $0x2] ss:$0 sm:$0xff] }
   0x7   :  { %2080 = vmatprep.subr.bf16.mxu0 %v2494_v0  ;;  %2082 = vmatprep.mubr.msk.bf16.mxu0 %vm2495_vm0, %v2494_v0 }
   0x8   :  { %2097 = vmatpush3.bf16.msra.mxu1 %v2577_v7 }
   0x9   :  { %2110 = vmatprep.subr.bf16.mxu1 %v2494_v0 }
   0xa   :  { %2081 = vmatpush3.bf16.msra.mxu0 %v2572_v6 }
   0xb   :  { %2086 = vmatprep.subr.bf16.mxu0 %v2494_v0 }
  0xc5   :  { %v107_v9 = vpop.f32.mrf.mxu0 }
  0xc6   :  { %v108_v10 = vadd.f32 %v1866_v8, %v107_v9 }
  0xc7   :  { %v2077_v11 = vpop.f32.mrf.mxu0 }
  0xc8   :  { %v161_v13 = vpack.c.bf16 %v108_v10, %v108_v10 }
  0xca   :  { %2083 = vmatmul.mubr.msk.bf16.vlgmr.msra.gmra.mxu0 %vm174_vm2, %v161_v13  ;;  %2099 = vmatmul.mubr.msk.bf16.vlgmr.msra.gmra.mxu1 %vm174_vm2, %v161_v13 }
  0xcb   :  { %2087 = vmatpush3.bf16.msra.mxu0 %v2589_v12  ;;  %2090 = vmatprep.mubr.msk.bf16.mxu0 %vm2495_vm0, %v2494_v0 }
  0xcc   :  { %2088 = vmatprep.subr.bf16.mxu0 %v2494_v0  ;;  %2111 = vmatpush3.bf16.msra.mxu1 %v2551_v4 }
  0xcd   :  { %2112 = vmatprep.subr.bf16.mxu1 %v2494_v0  ;;  %2114 = vmatprep.mubr.msk.bf16.mxu1 %vm2495_vm0, %v2494_v0 }
  0xcf   :  { %2089 = vmatpush3.bf16.msra.mxu0 %v2597_v14 }
  0xd0   :  { %2102 = vmatprep.subr.bf16.mxu0 %v2494_v0  ;;  %2113 = vmatpush3.bf16.msra.mxu1 %v2572_v6 }
  0xd1   :  { %2126 = vmatprep.subr.bf16.mxu1 %v2494_v0 }
  0xd2   :  { %2091 = vmatmul.mubr.msk.bf16.vlgmr.msra.gmra.mxu0 %vm174_vm2, %v161_v13 }
  0xd3   :  { %2103 = vmatpush3.bf16.msra.mxu0 %v2610_v15  ;;  %2106 = vmatprep.mubr.msk.bf16.mxu0 %vm2495_vm0, %v2494_v0 }
  0xd4   :  { %2104 = vmatprep.subr.bf16.mxu0 %v2494_v0 }
  0xd7   :  { %2105 = vmatpush3.bf16.msra.mxu0 %v2620_v16 }
  0xd8   :  { %2118 = vmatprep.subr.bf16.mxu0 %v2494_v0 }
  0xda   :  { %2107 = vmatmul.mubr.msk.bf16.vlgmr.msra.gmra.mxu0 %vm174_vm2, %v161_v13 }
  0xdb   :  { %2119 = vmatpush3.bf16.msra.mxu0 %v2589_v12  ;;  %2122 = vmatprep.mubr.msk.bf16.mxu0 %vm2495_vm0, %v2494_v0 }
  0xdc   :  { %2120 = vmatprep.subr.bf16.mxu0 %v2494_v0 }
  0xdf   :  { %2121 = vmatpush3.bf16.msra.mxu0 %v2597_v14 }
  0xe0   :  { %2134 = vmatprep.subr.bf16.mxu0 %v2494_v0 }
 0x18a   :  { %v212_v18 = vpop.f32.mrf.mxu0  ;;  %v316_v19 = vpop.f32.mrf.mxu1 }
 0x18b   :  { %v213_v20 = vadd.f32 %v2637_v17, %v212_v18  ;;  %v317_v45 = vadd.f32 %v2655_v41, %v316_v19 }
 0x18c   :  { %v2084_v21 = vpop.f32.mrf.mxu0  ;;  %v2100_v22 = vpop.f32.mrf.mxu1 }
 0x18d   :  { %v1899_v23 = vmul.f32 -1.442695, %v213_v20 }
 0x18e   :  { %v215_v24 = vpop.f32.mrf.mxu0  ;;  %v319_v25 = vpop.f32.mrf.mxu1 }
 0x18f   :  { %2364 = vpow2.f32 %v1899_v23 }
 0x190   :  { %v2085_v26 = vpop.f32.mrf.mxu0  ;;  %v2101_v27 = vpop.f32.mrf.mxu1 }
 0x192   :  { %v264_v29 = vpop.f32.mrf.mxu0 }
 0x193   :  { %v265_v30 = vadd.f32 %v2643_v28, %v264_v29 }
 0x194   :  { %v2092_v31 = vpop.f32.mrf.mxu0 }
 0x195   :  { %v1900_v32 = vmul.f32 -1.442695, %v265_v30 }
 0x196   :  { %v267_v33 = vpop.f32.mrf.mxu0 }
 0x197   :  { %2366 = vpow2.f32 %v1900_v32 }
 0x198   :  { %v2093_v34 = vpop.f32.mrf.mxu0 }
 0x19a   :  { %v368_v36 = vpop.f32.mrf.mxu0 }
 0x19b   :  { %v369_v37 = vadd.f32 %v2649_v35, %v368_v36 }
 0x19c   :  { %v2108_v38 = vpop.f32.mrf.mxu0  ;;  %v2365_v39 = vpop.eup %2364 }
 0x19d   :  { %v1901_v42 = vmul.f32 -1.442695, %v369_v37  ;;  %v377_v44 = vadd.f32 1.0, %v2365_v39 }
 0x19e   :  { %v371_v40 = vpop.f32.mrf.mxu0 }
 0x19f   :  { %2368 = vpow2.f32 %v1901_v42 }
 0x1a0   :  { %v2109_v43 = vpop.f32.mrf.mxu0  ;;  %2370 = vrcp.f32 %v377_v44 }
 0x1a1   :  { %2372 = vtanh.f32 %v317_v45 }
 0x1a4   :  { %v2367_v46 = vpop.eup %2366 }
 0x1a5   :  { %v383_v47 = vadd.f32 1.0, %v2367_v46 }
 0x1a7   :  { %2374 = vrcp.f32 %v383_v47 }
 0x1ac   :  { %v2369_v48 = vpop.eup %2368 }
 0x1ad   :  { %v2371_v49 = vpop.eup %2370  ;;  %v389_v52 = vadd.f32 1.0, %v2369_v48 }
 0x1ae   :  { %v2373_v50 = vpop.eup %2372 }
 0x1af   :  { %v394_v54 = vmul.f32 %v2373_v50, %v2371_v49  ;;  %2376 = vrcp.f32 %v389_v52 }
 0x1b4   :  { %v2375_v51 = vpop.eup %2374 }
 0x1b5   :  { %v393_v53 = vmul.f32 0.0, %v2375_v51 }
 0x1b7   :  { %v2658_v55 = vadd.f32 %v394_v54, %v393_v53 }
 0x1b9   :  { %2378 = vtanh.f32 %v2658_v55 }
 0x1bc   :  { %v2377_v56 = vpop.eup %2376 }
 0x1c6   :  { %v2379_v57 = vpop.eup %2378 }
 0x1c7   :  { %v2661_v58 = vmul.f32 %v2379_v57, %v2377_v56 }
 0x1c9   :  { %v398_v59 = vpack.c.bf16 %v2661_v58, %v2661_v58 }
 0x1cb   :  { %2115 = vmatmul.mubr.msk.bf16.vlgmr.msra.gmra.mxu1 %vm174_vm2, %v398_v59  ;;  %2123 = vmatmul.mubr.msk.bf16.vlgmr.msra.gmra.mxu0 %vm174_vm2, %v398_v59 }
 0x1cc   :  { %2127 = vmatpush3.bf16.msra.mxu1 %v2558_v5  ;;  %2135 = vmatpush3.bf16.msra.mxu0 %v2610_v15 }
 0x1cd   :  { %2128 = vmatprep.subr.bf16.mxu1 %v2494_v0  ;;  %2136 = vmatprep.subr.bf16.mxu0 %v2494_v0 }
 0x1ce   :  { %2130 = vmatprep.mubr.msk.bf16.mxu1 %vm2495_vm0, %v2494_v0  ;;  %2138 = vmatprep.mubr.msk.bf16.mxu0 %vm2495_vm0, %v2494_v0 }
 0x1d0   :  { %2129 = vmatpush3.bf16.msra.mxu1 %v2577_v7  ;;  %2137 = vmatpush3.bf16.msra.mxu0 %v2620_v16 }
 0x1d1   :  { %2142 = vmatprep.subr.bf16.mxu1 %v2494_v0  ;;  %2150 = vmatprep.subr.bf16.mxu0 %v2494_v0 }
 0x1d3   :  { %2131 = vmatmul.mubr.msk.bf16.vlgmr.msra.gmra.mxu1 %vm174_vm2, %v398_v59  ;;  %2139 = vmatmul.mubr.msk.bf16.vlgmr.msra.gmra.mxu0 %vm174_vm2, %v398_v59 }
 0x1d4   :  { %2143 = vmatpush3.bf16.msra.mxu1 %v2551_v4  ;;  %2151 = vmatpush3.bf16.msra.mxu0 %v2589_v12 }
 0x1d5   :  { %2144 = vmatprep.subr.bf16.mxu1 %v2494_v0  ;;  %2152 = vmatprep.subr.bf16.mxu0 %v2494_v0 }
 0x1d6   :  { %2146 = vmatprep.mubr.msk.bf16.mxu1 %vm2495_vm0, %v2494_v0  ;;  %2154 = vmatprep.mubr.msk.bf16.mxu0 %vm2495_vm0, %v2494_v0 }
 0x1d8   :  { %2145 = vmatpush3.bf16.msra.mxu1 %v2572_v6  ;;  %2153 = vmatpush3.bf16.msra.mxu0 %v2597_v14 }
 0x1d9   :  { %2158 = vmatprep.subr.bf16.mxu1 %v2494_v0  ;;  %2166 = vmatprep.subr.bf16.mxu0 %v2494_v0 }
 0x28b   :  { %v436_v60 = vpop.f32.mrf.mxu1  ;;  %v476_v61 = vpop.f32.mrf.mxu0 }
 0x28c   :  { %v437_v62 = vadd.f32 %v2637_v17, %v436_v60  ;;  %v477_v63 = vadd.f32 %v2643_v28, %v476_v61 }
 0x28d   :  { %v2116_v1 = vpop.f32.mrf.mxu1  ;;  %v2124_v2 = vpop.f32.mrf.mxu0 }
 0x28e   :  { %v1906_v3 = vmul.f32 -1.442695, %v437_v62  ;;  %v1907_v8 = vmul.f32 -1.442695, %v477_v63 }
 0x28f   :  { %v439_v9 = vpop.f32.mrf.mxu1  ;;  %v479_v10 = vpop.f32.mrf.mxu0 }
 0x290   :  { %2380 = vpow2.f32 %v1906_v3 }
 0x291   :  { %2382 = vpow2.f32 %v1907_v8  ;;  %v2117_v11 = vpop.f32.mrf.mxu1  ;;  %v2125_v13 = vpop.f32.mrf.mxu0 }
 0x293   :  { %v516_v18 = vpop.f32.mrf.mxu1  ;;  %v556_v19 = vpop.f32.mrf.mxu0 }
 0x294   :  { %v557_v22 = vadd.f32 %v2649_v35, %v556_v19  ;;  %v517_v29 = vadd.f32 %v2655_v41, %v516_v18 }
 0x295   :  { %v2132_v20 = vpop.f32.mrf.mxu1  ;;  %v2140_v21 = vpop.f32.mrf.mxu0 }
 0x296   :  { %v1908_v27 = vmul.f32 -1.442695, %v557_v22 }
 0x297   :  { %v519_v23 = vpop.f32.mrf.mxu1  ;;  %v559_v24 = vpop.f32.mrf.mxu0 }
 0x298   :  { %2384 = vpow2.f32 %v1908_v27 }
 0x299   :  { %v2133_v25 = vpop.f32.mrf.mxu1  ;;  %v2141_v26 = vpop.f32.mrf.mxu0  ;;  %2386 = vtanh.f32 %v517_v29 }
 0x29d   :  { %v2381_v30 = vpop.eup %2380 }
 0x29e   :  { %v2383_v31 = vpop.eup %2382  ;;  %v565_v32 = vadd.f32 1.0, %v2381_v30 }
 0x29f   :  { %v571_v33 = vadd.f32 1.0, %v2383_v31 }
 0x2a0   :  { %2388 = vrcp.f32 %v565_v32 }
 0x2a1   :  { %2390 = vrcp.f32 %v571_v33 }
 0x2a5   :  { %v2385_v34 = vpop.eup %2384 }
 0x2a6   :  { %v2387_v36 = vpop.eup %2386  ;;  %v577_v40 = vadd.f32 1.0, %v2385_v34 }
 0x2a8   :  { %2392 = vrcp.f32 %v577_v40 }
 0x2ad   :  { %v2389_v37 = vpop.eup %2388 }
 0x2ae   :  { %v2391_v38 = vpop.eup %2390  ;;  %v582_v39 = vmul.f32 %v2389_v37, %v2387_v36 }
 0x2af   :  { %v581_v42 = vmul.f32 %v2391_v38, %v2658_v55 }
 0x2b1   :  { %v2698_v43 = vadd.f32 %v582_v39, %v581_v42 }
 0x2b3   :  { %2394 = vtanh.f32 %v2698_v43 }
 0x2b5   :  { %v2393_v44 = vpop.eup %2392 }
 0x2c0   :  { %v2395_v45 = vpop.eup %2394 }
 0x2c1   :  { %v2701_v46 = vmul.f32 %v2395_v45, %v2393_v44 }
 0x2c3   :  { %v586_v47 = vpack.c.bf16 %v2701_v46, %v2701_v46 }
 0x2c5   :  { %2147 = vmatmul.mubr.msk.bf16.vlgmr.msra.gmra.mxu1 %vm174_vm2, %v586_v47  ;;  %2155 = vmatmul.mubr.msk.bf16.vlgmr.msra.gmra.mxu0 %vm174_vm2, %v586_v47 }
 0x2c6   :  { %2159 = vmatpush3.bf16.msra.mxu1 %v2558_v5  ;;  %2167 = vmatpush3.bf16.msra.mxu0 %v2610_v15 }
 0x2c7   :  { %2160 = vmatprep.subr.bf16.mxu1 %v2494_v0  ;;  %2168 = vmatprep.subr.bf16.mxu0 %v2494_v0 }
 0x2c8   :  { %2162 = vmatprep.mubr.msk.bf16.mxu1 %vm2495_vm0, %v2494_v0  ;;  %2170 = vmatprep.mubr.msk.bf16.mxu0 %vm2495_vm0, %v2494_v0 }
 0x2ca   :  { %2161 = vmatpush3.bf16.msra.mxu1 %v2577_v7  ;;  %2169 = vmatpush3.bf16.msra.mxu0 %v2620_v16 }
 0x2cb   :  { %2174 = vmatprep.subr.bf16.mxu1 %v2494_v0  ;;  %2182 = vmatprep.subr.bf16.mxu0 %v2494_v0 }
 0x2cd   :  { %2163 = vmatmul.mubr.msk.bf16.vlgmr.msra.gmra.mxu1 %vm174_vm2, %v586_v47  ;;  %2171 = vmatmul.mubr.msk.bf16.vlgmr.msra.gmra.mxu0 %vm174_vm2, %v586_v47 }
 0x2ce   :  { %2175 = vmatpush3.bf16.msra.mxu1 %v2551_v4  ;;  %2183 = vmatpush3.bf16.msra.mxu0 %v2589_v12 }
 0x2cf   :  { %2176 = vmatprep.subr.bf16.mxu1 %v2494_v0  ;;  %2184 = vmatprep.subr.bf16.mxu0 %v2494_v0 }
 0x2d0   :  { %2178 = vmatprep.mubr.msk.bf16.mxu1 %vm2495_vm0, %v2494_v0  ;;  %2186 = vmatprep.mubr.msk.bf16.mxu0 %vm2495_vm0, %v2494_v0 }
 0x2d2   :  { %2177 = vmatpush3.bf16.msra.mxu1 %v2572_v6  ;;  %2185 = vmatpush3.bf16.msra.mxu0 %v2597_v14 }
 0x2d3   :  { %2190 = vmatprep.subr.bf16.mxu1 %v2494_v0  ;;  %2198 = vmatprep.subr.bf16.mxu0 %v2494_v0 }
 0x385   :  { %v624_v48 = vpop.f32.mrf.mxu1  ;;  %v664_v49 = vpop.f32.mrf.mxu0 }
 0x386   :  { %v625_v50 = vadd.f32 %v2637_v17, %v624_v48  ;;  %v665_v51 = vadd.f32 %v2643_v28, %v664_v49 }
 0x387   :  { %v2148_v52 = vpop.f32.mrf.mxu1  ;;  %v2156_v53 = vpop.f32.mrf.mxu0 }
 0x388   :  { %v1913_v54 = vmul.f32 -1.442695, %v625_v50  ;;  %v1914_v55 = vmul.f32 -1.442695, %v665_v51 }
 0x389   :  { %v627_v56 = vpop.f32.mrf.mxu1  ;;  %v667_v57 = vpop.f32.mrf.mxu0 }
 0x38a   :  { %2396 = vpow2.f32 %v1913_v54 }
 0x38b   :  { %2398 = vpow2.f32 %v1914_v55  ;;  %v2149_v59 = vpop.f32.mrf.mxu1  ;;  %v2157_v60 = vpop.f32.mrf.mxu0 }
 0x38d   :  { %v704_v61 = vpop.f32.mrf.mxu1  ;;  %v744_v62 = vpop.f32.mrf.mxu0 }
 0x38e   :  { %v745_v2 = vadd.f32 %v2649_v35, %v744_v62  ;;  %v705_v13 = vadd.f32 %v2655_v41, %v704_v61 }
 0x38f   :  { %v2164_v63 = vpop.f32.mrf.mxu1  ;;  %v2172_v1 = vpop.f32.mrf.mxu0 }
 0x390   :  { %v1915_v11 = vmul.f32 -1.442695, %v745_v2 }
 0x391   :  { %v707_v3 = vpop.f32.mrf.mxu1  ;;  %v747_v8 = vpop.f32.mrf.mxu0 }
 0x392   :  { %2400 = vpow2.f32 %v1915_v11 }
 0x393   :  { %v2165_v9 = vpop.f32.mrf.mxu1  ;;  %v2173_v10 = vpop.f32.mrf.mxu0  ;;  %2402 = vtanh.f32 %v705_v13 }
 0x397   :  { %v2397_v18 = vpop.eup %2396 }
 0x398   :  { %v2399_v19 = vpop.eup %2398  ;;  %v753_v20 = vadd.f32 1.0, %v2397_v18 }
 0x399   :  { %v759_v21 = vadd.f32 1.0, %v2399_v19 }
 0x39a   :  { %2404 = vrcp.f32 %v753_v20 }
 0x39b   :  { %2406 = vrcp.f32 %v759_v21 }
 0x39f   :  { %v2401_v22 = vpop.eup %2400 }
 0x3a0   :  { %v2403_v23 = vpop.eup %2402  ;;  %v765_v27 = vadd.f32 1.0, %v2401_v22 }
 0x3a2   :  { %2408 = vrcp.f32 %v765_v27 }
 0x3a7   :  { %v2405_v24 = vpop.eup %2404 }
 0x3a8   :  { %v2407_v25 = vpop.eup %2406  ;;  %v770_v26 = vmul.f32 %v2405_v24, %v2403_v23 }
 0x3a9   :  { %v769_v29 = vmul.f32 %v2407_v25, %v2698_v43 }
 0x3ab   :  { %v2738_v30 = vadd.f32 %v770_v26, %v769_v29 }
 0x3ad   :  { %2410 = vtanh.f32 %v2738_v30 }
 0x3af   :  { %v2409_v31 = vpop.eup %2408 }
 0x3ba   :  { %v2411_v32 = vpop.eup %2410 }
 0x3bb   :  { %v2741_v33 = vmul.f32 %v2411_v32, %v2409_v31 }
 0x3bd   :  { %v774_v34 = vpack.c.bf16 %v2741_v33, %v2741_v33 }
 0x3bf   :  { %2179 = vmatmul.mubr.msk.bf16.vlgmr.msra.gmra.mxu1 %vm174_vm2, %v774_v34  ;;  %2187 = vmatmul.mubr.msk.bf16.vlgmr.msra.gmra.mxu0 %vm174_vm2, %v774_v34 }
 0x3c0   :  { %2191 = vmatpush3.bf16.msra.mxu1 %v2558_v5  ;;  %2199 = vmatpush3.bf16.msra.mxu0 %v2610_v15 }
 0x3c1   :  { %2192 = vmatprep.subr.bf16.mxu1 %v2494_v0  ;;  %2200 = vmatprep.subr.bf16.mxu0 %v2494_v0 }
 0x3c2   :  { %2194 = vmatprep.mubr.msk.bf16.mxu1 %vm2495_vm0, %v2494_v0  ;;  %2202 = vmatprep.mubr.msk.bf16.mxu0 %vm2495_vm0, %v2494_v0 }
 0x3c4   :  { %2193 = vmatpush3.bf16.msra.mxu1 %v2577_v7  ;;  %2201 = vmatpush3.bf16.msra.mxu0 %v2620_v16 }
 0x3c5   :  { %2206 = vmatprep.subr.bf16.mxu1 %v2494_v0  ;;  %2214 = vmatprep.subr.bf16.mxu0 %v2494_v0 }
 0x3c7   :  { %2195 = vmatmul.mubr.msk.bf16.vlgmr.msra.gmra.mxu1 %vm174_vm2, %v774_v34  ;;  %2203 = vmatmul.mubr.msk.bf16.vlgmr.msra.gmra.mxu0 %vm174_vm2, %v774_v34 }
 0x3c8   :  { %2207 = vmatpush3.bf16.msra.mxu1 %v2551_v4  ;;  %2215 = vmatpush3.bf16.msra.mxu0 %v2589_v12 }
 0x3c9   :  { %2208 = vmatprep.subr.bf16.mxu1 %v2494_v0  ;;  %2216 = vmatprep.subr.bf16.mxu0 %v2494_v0 }
 0x3ca   :  { %2210 = vmatprep.mubr.msk.bf16.mxu1 %vm2495_vm0, %v2494_v0  ;;  %2218 = vmatprep.mubr.msk.bf16.mxu0 %vm2495_vm0, %v2494_v0 }
 0x3cc   :  { %2209 = vmatpush3.bf16.msra.mxu1 %v2572_v6  ;;  %2217 = vmatpush3.bf16.msra.mxu0 %v2597_v14 }
 0x3cd   :  { %2222 = vmatprep.subr.bf16.mxu1 %v2494_v0  ;;  %2230 = vmatprep.subr.bf16.mxu0 %v2494_v0 }
 0x47f   :  { %v812_v36 = vpop.f32.mrf.mxu1  ;;  %v852_v37 = vpop.f32.mrf.mxu0 }
 0x480   :  { %v813_v38 = vadd.f32 %v2637_v17, %v812_v36  ;;  %v853_v39 = vadd.f32 %v2643_v28, %v852_v37 }
 0x481   :  { %v2180_v40 = vpop.f32.mrf.mxu1  ;;  %v2188_v42 = vpop.f32.mrf.mxu0 }
 0x482   :  { %v1920_v43 = vmul.f32 -1.442695, %v813_v38  ;;  %v1921_v44 = vmul.f32 -1.442695, %v853_v39 }
 0x483   :  { %v815_v45 = vpop.f32.mrf.mxu1  ;;  %v855_v47 = vpop.f32.mrf.mxu0 }
 0x484   :  { %2412 = vpow2.f32 %v1920_v43 }
 0x485   :  { %2414 = vpow2.f32 %v1921_v44  ;;  %v2181_v48 = vpop.f32.mrf.mxu1  ;;  %v2189_v49 = vpop.f32.mrf.mxu0 }
 0x487   :  { %v892_v50 = vpop.f32.mrf.mxu1  ;;  %v932_v51 = vpop.f32.mrf.mxu0 }
 0x488   :  { %v933_v54 = vadd.f32 %v2649_v35, %v932_v51  ;;  %v893_v61 = vadd.f32 %v2655_v41, %v892_v50 }
 0x489   :  { %v2196_v52 = vpop.f32.mrf.mxu1  ;;  %v2204_v53 = vpop.f32.mrf.mxu0 }
 0x48a   :  { %v1922_v60 = vmul.f32 -1.442695, %v933_v54 }
 0x48b   :  { %v895_v55 = vpop.f32.mrf.mxu1  ;;  %v935_v56 = vpop.f32.mrf.mxu0 }
 0x48c   :  { %2416 = vpow2.f32 %v1922_v60 }
 0x48d   :  { %v2197_v57 = vpop.f32.mrf.mxu1  ;;  %v2205_v59 = vpop.f32.mrf.mxu0  ;;  %2418 = vtanh.f32 %v893_v61 }
 0x491   :  { %v2413_v62 = vpop.eup %2412 }
 0x492   :  { %v2415_v63 = vpop.eup %2414  ;;  %v941_v1 = vadd.f32 1.0, %v2413_v62 }
 0x493   :  { %v947_v2 = vadd.f32 1.0, %v2415_v63 }
 0x494   :  { %2420 = vrcp.f32 %v941_v1 }
 0x495   :  { %2422 = vrcp.f32 %v947_v2 }
 0x499   :  { %v2417_v3 = vpop.eup %2416 }
 0x49a   :  { %v2419_v8 = vpop.eup %2418  ;;  %v953_v13 = vadd.f32 1.0, %v2417_v3 }
 0x49c   :  { %2424 = vrcp.f32 %v953_v13 }
 0x4a1   :  { %v2421_v9 = vpop.eup %2420 }
 0x4a2   :  { %v2423_v10 = vpop.eup %2422  ;;  %v958_v11 = vmul.f32 %v2421_v9, %v2419_v8 }
 0x4a3   :  { %v957_v18 = vmul.f32 %v2423_v10, %v2738_v30 }
 0x4a5   :  { %v2778_v19 = vadd.f32 %v958_v11, %v957_v18 }
 0x4a7   :  { %2426 = vtanh.f32 %v2778_v19 }
 0x4a9   :  { %v2425_v20 = vpop.eup %2424 }
 0x4b4   :  { %v2427_v21 = vpop.eup %2426 }
 0x4b5   :  { %v2781_v22 = vmul.f32 %v2427_v21, %v2425_v20 }
 0x4b7   :  { %v962_v23 = vpack.c.bf16 %v2781_v22, %v2781_v22 }
 0x4b9   :  { %2211 = vmatmul.mubr.msk.bf16.vlgmr.msra.gmra.mxu1 %vm174_vm2, %v962_v23  ;;  %2219 = vmatmul.mubr.msk.bf16.vlgmr.msra.gmra.mxu0 %vm174_vm2, %v962_v23 }
 0x4ba   :  { %2223 = vmatpush3.bf16.msra.mxu1 %v2558_v5  ;;  %2231 = vmatpush3.bf16.msra.mxu0 %v2610_v15 }
 0x4bb   :  { %2224 = vmatprep.subr.bf16.mxu1 %v2494_v0  ;;  %2232 = vmatprep.subr.bf16.mxu0 %v2494_v0 }
 0x4bc   :  { %2226 = vmatprep.mubr.msk.bf16.mxu1 %vm2495_vm0, %v2494_v0  ;;  %2234 = vmatprep.mubr.msk.bf16.mxu0 %vm2495_vm0, %v2494_v0 }
 0x4be   :  { %2225 = vmatpush3.bf16.msra.mxu1 %v2577_v7  ;;  %2233 = vmatpush3.bf16.msra.mxu0 %v2620_v16 }
 0x4bf   :  { %2238 = vmatprep.subr.bf16.mxu1 %v2494_v0  ;;  %2246 = vmatprep.subr.bf16.mxu0 %v2494_v0 }
 0x4c1   :  { %2227 = vmatmul.mubr.msk.bf16.vlgmr.msra.gmra.mxu1 %vm174_vm2, %v962_v23  ;;  %2235 = vmatmul.mubr.msk.bf16.vlgmr.msra.gmra.mxu0 %vm174_vm2, %v962_v23 }
 0x4c2   :  { %2239 = vmatpush3.bf16.msra.mxu1 %v2551_v4  ;;  %2247 = vmatpush3.bf16.msra.mxu0 %v2589_v12 }
 0x4c3   :  { %2240 = vmatprep.subr.bf16.mxu1 %v2494_v0  ;;  %2248 = vmatprep.subr.bf16.mxu0 %v2494_v0 }
 0x4c4   :  { %2242 = vmatprep.mubr.msk.bf16.mxu1 %vm2495_vm0, %v2494_v0  ;;  %2250 = vmatprep.mubr.msk.bf16.mxu0 %vm2495_vm0, %v2494_v0 }
 0x4c6   :  { %2241 = vmatpush3.bf16.msra.mxu1 %v2572_v6  ;;  %2249 = vmatpush3.bf16.msra.mxu0 %v2597_v14 }
 0x4c7   :  { %2254 = vmatprep.subr.bf16.mxu1 %v2494_v0  ;;  %2262 = vmatprep.subr.bf16.mxu0 %v2494_v0 }
 0x579   :  { %v1000_v24 = vpop.f32.mrf.mxu1  ;;  %v1040_v25 = vpop.f32.mrf.mxu0 }
 0x57a   :  { %v1001_v26 = vadd.f32 %v2637_v17, %v1000_v24  ;;  %v1041_v27 = vadd.f32 %v2643_v28, %v1040_v25 }
 0x57b   :  { %v2212_v29 = vpop.f32.mrf.mxu1  ;;  %v2220_v30 = vpop.f32.mrf.mxu0 }
 0x57c   :  { %v1927_v31 = vmul.f32 -1.442695, %v1001_v26  ;;  %v1928_v32 = vmul.f32 -1.442695, %v1041_v27 }
 0x57d   :  { %v1003_v34 = vpop.f32.mrf.mxu1  ;;  %v1043_v36 = vpop.f32.mrf.mxu0 }
 0x57e   :  { %2428 = vpow2.f32 %v1927_v31 }
 0x57f   :  { %2430 = vpow2.f32 %v1928_v32  ;;  %v2213_v37 = vpop.f32.mrf.mxu1  ;;  %v2221_v38 = vpop.f32.mrf.mxu0 }
 0x581   :  { %v1080_v39 = vpop.f32.mrf.mxu1  ;;  %v1120_v40 = vpop.f32.mrf.mxu0 }
 0x582   :  { %v1121_v44 = vadd.f32 %v2649_v35, %v1120_v40  ;;  %v1081_v51 = vadd.f32 %v2655_v41, %v1080_v39 }
 0x583   :  { %v2228_v42 = vpop.f32.mrf.mxu1  ;;  %v2236_v43 = vpop.f32.mrf.mxu0 }
 0x584   :  { %v1929_v50 = vmul.f32 -1.442695, %v1121_v44 }
 0x585   :  { %v1083_v45 = vpop.f32.mrf.mxu1  ;;  %v1123_v47 = vpop.f32.mrf.mxu0 }
 0x586   :  { %2432 = vpow2.f32 %v1929_v50 }
 0x587   :  { %v2229_v48 = vpop.f32.mrf.mxu1  ;;  %v2237_v49 = vpop.f32.mrf.mxu0  ;;  %2434 = vtanh.f32 %v1081_v51 }
 0x58b   :  { %v2429_v52 = vpop.eup %2428 }
 0x58c   :  { %v2431_v53 = vpop.eup %2430  ;;  %v1129_v54 = vadd.f32 1.0, %v2429_v52 }
 0x58d   :  { %v1135_v55 = vadd.f32 1.0, %v2431_v53 }
 0x58e   :  { %2436 = vrcp.f32 %v1129_v54 }
 0x58f   :  { %2438 = vrcp.f32 %v1135_v55 }
 0x593   :  { %v2433_v56 = vpop.eup %2432 }
 0x594   :  { %v2435_v57 = vpop.eup %2434  ;;  %v1141_v62 = vadd.f32 1.0, %v2433_v56 }
 0x596   :  { %2440 = vrcp.f32 %v1141_v62 }
 0x59b   :  { %v2437_v59 = vpop.eup %2436 }
 0x59c   :  { %v2439_v60 = vpop.eup %2438  ;;  %v1146_v61 = vmul.f32 %v2437_v59, %v2435_v57 }
 0x59d   :  { %v1145_v63 = vmul.f32 %v2439_v60, %v2778_v19 }
 0x59f   :  { %v2818_v1 = vadd.f32 %v1146_v61, %v1145_v63 }
 0x5a1   :  { %2442 = vtanh.f32 %v2818_v1 }
 0x5a3   :  { %v2441_v2 = vpop.eup %2440 }
 0x5ae   :  { %v2443_v3 = vpop.eup %2442 }
 0x5af   :  { %v2821_v8 = vmul.f32 %v2443_v3, %v2441_v2 }
 0x5b1   :  { %v1150_v9 = vpack.c.bf16 %v2821_v8, %v2821_v8 }
 0x5b3   :  { %2243 = vmatmul.mubr.msk.bf16.vlgmr.msra.gmra.mxu1 %vm174_vm2, %v1150_v9  ;;  %2251 = vmatmul.mubr.msk.bf16.vlgmr.msra.gmra.mxu0 %vm174_vm2, %v1150_v9 }
 0x5b4   :  { %2255 = vmatpush3.bf16.msra.mxu1 %v2558_v5  ;;  %2263 = vmatpush3.bf16.msra.mxu0 %v2610_v15 }
 0x5b5   :  { %2256 = vmatprep.subr.bf16.mxu1 %v2494_v0  ;;  %2264 = vmatprep.subr.bf16.mxu0 %v2494_v0 }
 0x5b6   :  { %2258 = vmatprep.mubr.msk.bf16.mxu1 %vm2495_vm0, %v2494_v0  ;;  %2266 = vmatprep.mubr.msk.bf16.mxu0 %vm2495_vm0, %v2494_v0 }
 0x5b8   :  { %2257 = vmatpush3.bf16.msra.mxu1 %v2577_v7  ;;  %2265 = vmatpush3.bf16.msra.mxu0 %v2620_v16 }
 0x5b9   :  { %2270 = vmatprep.subr.bf16.mxu1 %v2494_v0  ;;  %2278 = vmatprep.subr.bf16.mxu0 %v2494_v0 }
 0x5bb   :  { %2259 = vmatmul.mubr.msk.bf16.vlgmr.msra.gmra.mxu1 %vm174_vm2, %v1150_v9  ;;  %2267 = vmatmul.mubr.msk.bf16.vlgmr.msra.gmra.mxu0 %vm174_vm2, %v1150_v9 }
 0x5bc   :  { %2271 = vmatpush3.bf16.msra.mxu1 %v2551_v4  ;;  %2279 = vmatpush3.bf16.msra.mxu0 %v2589_v12 }
 0x5bd   :  { %2272 = vmatprep.subr.bf16.mxu1 %v2494_v0  ;;  %2280 = vmatprep.subr.bf16.mxu0 %v2494_v0 }
 0x5be   :  { %2274 = vmatprep.mubr.msk.bf16.mxu1 %vm2495_vm0, %v2494_v0  ;;  %2282 = vmatprep.mubr.msk.bf16.mxu0 %vm2495_vm0, %v2494_v0 }
 0x5c0   :  { %2273 = vmatpush3.bf16.msra.mxu1 %v2572_v6  ;;  %2281 = vmatpush3.bf16.msra.mxu0 %v2597_v14 }
 0x5c1   :  { %2286 = vmatprep.subr.bf16.mxu1 %v2494_v0  ;;  %2294 = vmatprep.subr.bf16.mxu0 %v2494_v0 }
 0x673   :  { %v1188_v10 = vpop.f32.mrf.mxu1  ;;  %v1228_v11 = vpop.f32.mrf.mxu0 }
 0x674   :  { %v1189_v13 = vadd.f32 %v2637_v17, %v1188_v10  ;;  %v1229_v18 = vadd.f32 %v2643_v28, %v1228_v11 }
 0x675   :  { %v2244_v19 = vpop.f32.mrf.mxu1  ;;  %v2252_v20 = vpop.f32.mrf.mxu0 }
 0x676   :  { %v1934_v21 = vmul.f32 -1.442695, %v1189_v13  ;;  %v1935_v23 = vmul.f32 -1.442695, %v1229_v18 }
 0x677   :  { %v1191_v24 = vpop.f32.mrf.mxu1  ;;  %v1231_v25 = vpop.f32.mrf.mxu0 }
 0x678   :  { %2444 = vpow2.f32 %v1934_v21 }
 0x679   :  { %2446 = vpow2.f32 %v1935_v23  ;;  %v2245_v26 = vpop.f32.mrf.mxu1  ;;  %v2253_v27 = vpop.f32.mrf.mxu0 }
 0x67b   :  { %v1268_v29 = vpop.f32.mrf.mxu1  ;;  %v1308_v30 = vpop.f32.mrf.mxu0 }
 0x67c   :  { %v1309_v34 = vadd.f32 %v2649_v35, %v1308_v30  ;;  %v1269_v42 = vadd.f32 %v2655_v41, %v1268_v29 }
 0x67d   :  { %v2260_v31 = vpop.f32.mrf.mxu1  ;;  %v2268_v32 = vpop.f32.mrf.mxu0 }
 0x67e   :  { %v1936_v40 = vmul.f32 -1.442695, %v1309_v34 }
 0x67f   :  { %v1271_v36 = vpop.f32.mrf.mxu1  ;;  %v1311_v37 = vpop.f32.mrf.mxu0 }
 0x680   :  { %2448 = vpow2.f32 %v1936_v40 }
 0x681   :  { %v2261_v38 = vpop.f32.mrf.mxu1  ;;  %v2269_v39 = vpop.f32.mrf.mxu0  ;;  %2450 = vtanh.f32 %v1269_v42 }
 0x685   :  { %v2445_v43 = vpop.eup %2444 }
 0x686   :  { %v2447_v44 = vpop.eup %2446  ;;  %v1317_v45 = vadd.f32 1.0, %v2445_v43 }
 0x687   :  { %v1323_v47 = vadd.f32 1.0, %v2447_v44 }
 0x688   :  { %2452 = vrcp.f32 %v1317_v45 }
 0x689   :  { %2454 = vrcp.f32 %v1323_v47  ;;  %v2492_v47 = vld [vmem:[%s2979_s3 + $0x28] sm:$0xff]  }
 0x68d   :  { %v2449_v48 = vpop.eup %2448 }
 0x68e   :  { %v2451_v49 = vpop.eup %2450  ;;  %v1329_v53 = vadd.f32 1.0, %v2449_v48  ;;  %v1717_v48 = vld [vmem:[%s2982_s5 + $0x18] sm:$0xff] }
 0x690   :  { %2456 = vrcp.f32 %v1329_v53 }
 0x695   :  { %v2453_v50 = vpop.eup %2452 }
 0x696   :  { %v2455_v51 = vpop.eup %2454  ;;  %v1334_v52 = vmul.f32 %v2453_v50, %v2451_v49  ;;  %v2493_v49 = vld [vmem:[%s2979_s3 + $0x20] sm:$0xff]  }
 0x697   :  { %v1333_v54 = vmul.f32 %v2455_v51, %v2818_v1 }
 0x699   :  { %v2858_v55 = vadd.f32 %v1334_v52, %v1333_v54 }
 0x69b   :  { %2458 = vtanh.f32 %v2858_v55 }
 0x69d   :  { %v2457_v56 = vpop.eup %2456 }
 0x6a8   :  { %v2459_v57 = vpop.eup %2458 }
 0x6a9   :  { %v2861_v59 = vmul.f32 %v2459_v57, %v2457_v56 }
 0x6ab   :  { %v1338_v60 = vpack.c.bf16 %v2861_v59, %v2861_v59 }
 0x6ad   :  { %2275 = vmatmul.mubr.msk.bf16.vlgmr.msra.gmra.mxu1 %vm174_vm2, %v1338_v60  ;;  %2283 = vmatmul.mubr.msk.bf16.vlgmr.msra.gmra.mxu0 %vm174_vm2, %v1338_v60 }
 0x6ae   :  { %2287 = vmatpush3.bf16.msra.mxu1 %v2558_v5  ;;  %2295 = vmatpush3.bf16.msra.mxu0 %v2610_v15 }
 0x6af   :  { %2288 = vmatprep.subr.bf16.mxu1 %v2494_v0  ;;  %2296 = vmatprep.subr.bf16.mxu0 %v2494_v0 }
 0x6b0   :  { %2290 = vmatprep.mubr.msk.bf16.mxu1 %vm2495_vm0, %v2494_v0  ;;  %2298 = vmatprep.mubr.msk.bf16.mxu0 %vm2495_vm0, %v2494_v0 }
 0x6b2   :  { %2289 = vmatpush3.bf16.msra.mxu1 %v2577_v7  ;;  %2297 = vmatpush3.bf16.msra.mxu0 %v2620_v16 }
 0x6b3   :  { %2302 = vmatprep.subr.bf16.mxu1 %v2494_v0  ;;  %2310 = vmatprep.subr.bf16.mxu0 %v2494_v0 }
 0x6b5   :  { %2291 = vmatmul.mubr.msk.bf16.vlgmr.msra.gmra.mxu1 %vm174_vm2, %v1338_v60  ;;  %2299 = vmatmul.mubr.msk.bf16.vlgmr.msra.gmra.mxu0 %vm174_vm2, %v1338_v60 }
 0x6b6   :  { %2303 = vmatpush3.bf16.msra.mxu1 %v2551_v4  ;;  %2311 = vmatpush3.bf16.msra.mxu0 %v2589_v12 }
 0x6b7   :  { %2304 = vmatprep.subr.bf16.mxu1 %v2494_v0  ;;  %2312 = vmatprep.subr.bf16.mxu0 %v2494_v0 }
 0x6b8   :  { %2306 = vmatprep.mubr.msk.bf16.mxu1 %vm2495_vm0, %v2494_v0  ;;  %2314 = vmatprep.mubr.msk.bf16.mxu0 %vm2495_vm0, %v2494_v0 }
 0x6ba   :  { %2305 = vmatpush3.bf16.msra.mxu1 %v2572_v6  ;;  %2313 = vmatpush3.bf16.msra.mxu0 %v2597_v14 }
 0x6bb   :  { %2318 = vmatprep.subr.bf16.mxu1 %v2494_v0  ;;  %2326 = vmatprep.subr.bf16.mxu0 %v2494_v0 }
 0x76d   :  { %v1376_v4 = vpop.f32.mrf.mxu1  ;;  %v1416_v5 = vpop.f32.mrf.mxu0 }
 0x76e   :  { %v1377_v7 = vadd.f32 %v2637_v17, %v1376_v4  ;;  %v1417_v12 = vadd.f32 %v2643_v28, %v1416_v5 }
 0x76f   :  { %v2276_v61 = vpop.f32.mrf.mxu1  ;;  %v2284_v62 = vpop.f32.mrf.mxu0 }
 0x770   :  { %v1941_v63 = vmul.f32 -1.442695, %v1377_v7  ;;  %v1942_v1 = vmul.f32 -1.442695, %v1417_v12  ;;  %v1951_v61 = vld [vmem:[%s2983_s6] ss:$0 sm:$0xff] }
 0x771   :  { %v1379_v2 = vpop.f32.mrf.mxu1  ;;  %v1419_v3 = vpop.f32.mrf.mxu0 }
 0x772   :  { %2460 = vpow2.f32 %v1941_v63 }
 0x773   :  { %2462 = vpow2.f32 %v1942_v1  ;;  %v2277_v6 = vpop.f32.mrf.mxu1  ;;  %v2285_v14 = vpop.f32.mrf.mxu0 }
 0x775   :  { %v1456_v9 = vpop.f32.mrf.mxu1  ;;  %v1496_v10 = vpop.f32.mrf.mxu0 }
 0x776   :  { %v1497_v18 = vadd.f32 %v2649_v35, %v1496_v10  ;;  %v1457_v25 = vadd.f32 %v2655_v41, %v1456_v9 }
 0x777   :  { %v2292_v11 = vpop.f32.mrf.mxu1  ;;  %v2300_v13 = vpop.f32.mrf.mxu0 }
 0x778   :  { %v1943_v24 = vmul.f32 -1.442695, %v1497_v18 }
 0x779   :  { %v1459_v19 = vpop.f32.mrf.mxu1  ;;  %v1499_v20 = vpop.f32.mrf.mxu0 }
 0x77a   :  { %2464 = vpow2.f32 %v1943_v24 }
 0x77b   :  { %v2293_v21 = vpop.f32.mrf.mxu1  ;;  %v2301_v23 = vpop.f32.mrf.mxu0  ;;  %2466 = vtanh.f32 %v1457_v25 }
 0x77f   :  { %v2461_v26 = vpop.eup %2460 }
 0x780   :  { %v2463_v27 = vpop.eup %2462  ;;  %v1505_v29 = vadd.f32 1.0, %v2461_v26 }
 0x781   :  { %v1511_v30 = vadd.f32 1.0, %v2463_v27 }
 0x782   :  { %2468 = vrcp.f32 %v1505_v29 }
 0x783   :  { %2470 = vrcp.f32 %v1511_v30 }
 0x787   :  { %v2465_v31 = vpop.eup %2464 }
 0x788   :  { %v2467_v32 = vpop.eup %2466  ;;  %v1517_v38 = vadd.f32 1.0, %v2465_v31 }
 0x78a   :  { %2472 = vrcp.f32 %v1517_v38 }
 0x78f   :  { %v2469_v34 = vpop.eup %2468 }
 0x790   :  { %v2471_v36 = vpop.eup %2470  ;;  %v1522_v37 = vmul.f32 %v2469_v34, %v2467_v32 }
 0x791   :  { %v1521_v39 = vmul.f32 %v2471_v36, %v2858_v55 }
 0x793   :  { %v2898_v40 = vadd.f32 %v1522_v37, %v1521_v39 }
 0x795   :  { %2474 = vtanh.f32 %v2898_v40 }
 0x797   :  { %v2473_v42 = vpop.eup %2472 }
 0x7a2   :  { %v2475_v43 = vpop.eup %2474 }
 0x7a3   :  { %v1525_v44 = vmul.f32 %v2475_v43, %v2473_v42 }
 0x7a5   :  { %v1526_v45 = vpack.c.bf16 %v1525_v44, %v1525_v44 }
 0x7a7   :  { %2307 = vmatmul.mubr.msk.bf16.vlgmr.msra.gmra.mxu1 %vm174_vm2, %v1526_v45  ;;  %2315 = vmatmul.mubr.msk.bf16.vlgmr.msra.gmra.mxu0 %vm174_vm2, %v1526_v45 }
 0x7a8   :  { %2319 = vmatpush3.bf16.msra.mxu1 %v2492_v47  ;;  %2327 = vmatpush3.bf16.msra.mxu0 %v2610_v15  ;;  %v1716_v15 = vld [vmem:[%s2982_s5 + $0x10] sm:$0xff] }
 0x7a9   :  { %2320 = vmatprep.subr.bf16.mxu1 %v2494_v0  ;;  %2328 = vmatprep.subr.bf16.mxu0 %v2494_v0 }
 0x7aa   :  { %2322 = vmatprep.mubr.msk.bf16.mxu1 %vm2495_vm0, %v2494_v0  ;;  %2330 = vmatprep.mubr.msk.bf16.mxu0 %vm2495_vm0, %v2494_v0  ;;  %v1715_v0 = vld [vmem:[%s2982_s5 + $0x8] sm:$0xff] }
 0x7ac   :  { %2321 = vmatpush3.bf16.msra.mxu1 %v2493_v49  ;;  %2329 = vmatpush3.bf16.msra.mxu0 %v2620_v16  ;;  %v1714_v16 = vld [vmem:[%s2982_s5] sm:$0xff] }
 0x7ad   :  { %2334 = vmatprep.subr.mxu1 %v1717_v48 }
 0x7af   :  { %2323 = vmatmul.mubr.msk.bf16.vlgmr.msra.gmra.mxu1 %vm174_vm2, %v1526_v45  ;;  %2331 = vmatmul.mubr.msk.bf16.vlgmr.msra.gmra.mxu0 %vm174_vm2, %v1526_v45 }
 0x7b0   :  { %2335 = vmatpush3.msra.mxu1 %v1717_v48  ;;  %2342 = vmatprep.mubr.msk.f32.mxu1 %vm174_vm2, %v2661_v58 }
 0x7b1   :  { %2336 = vmatprep.subr.mxu1 %v1716_v15 }
 0x7b2   :  { %2337 = vmatpush3.msra.mxu1 %v1716_v15 }
 0x7b3   :  { %2338 = vmatprep.subr.mxu1 %v1715_v0 }
 0x7b4   :  { %2339 = vmatpush3.msra.mxu1 %v1715_v0 }
 0x7b5   :  { %2340 = vmatprep.subr.mxu1 %v1714_v16 }
 0x7b6   :  { %2341 = vmatpush3.msra.mxu1 %v1714_v16 }
 0x7b7   :  { %2343 = vmatmul.mubr.msk.f32.vlgmr.msra.gmra.mxu1 %vm174_vm2, %v2701_v46 }
 0x7b8   :  { %2345 = vmatprep.mubr.msk.f32.mxu1 %vm174_vm2, %v2741_v33 }
 0x7bb   :  { %2346 = vmatmul.mubr.msk.f32.gmra.mxu1 %vm174_vm2, %v2781_v22 }
 0x7bc   :  { %2348 = vmatprep.mubr.msk.f32.mxu1 %vm174_vm2, %v2821_v8 }
 0x7bf   :  { %2349 = vmatmul.mubr.msk.f32.gmra.mxu1 %vm174_vm2, %v2861_v59 }
 0x7c0   :  { %2351 = vmatprep.mubr.msk.f32.mxu1 %vm174_vm2, %v1525_v44 }
 0x867   :  { %v1564_v58 = vpop.f32.mrf.mxu1  ;;  %v1604_v50 = vpop.f32.mrf.mxu0 }
 0x868   :  { %v1565_v51 = vadd.f32 %v2637_v17, %v1564_v58  ;;  %v1605_v46 = vadd.f32 %v2643_v28, %v1604_v50 }
 0x869   :  { %v2308_v52 = vpop.f32.mrf.mxu1  ;;  %v2316_v53 = vpop.f32.mrf.mxu0 }
 0x86a   :  { %v1948_v33 = vmul.f32 -1.442695, %v1565_v51  ;;  %v1949_v54 = vmul.f32 -1.442695, %v1605_v46 }
 0x86b   :  { %v1567_v55 = vpop.f32.mrf.mxu1  ;;  %v1607_v22 = vpop.f32.mrf.mxu0 }
 0x86c   :  { %2476 = vpow2.f32 %v1948_v33 }
 0x86d   :  { %2478 = vpow2.f32 %v1949_v54  ;;  %v2309_v8 = vpop.f32.mrf.mxu1  ;;  %v2317_v56 = vpop.f32.mrf.mxu0 }
 0x86f   :  { %v1644_v57 = vpop.f32.mrf.mxu1  ;;  %v1684_v59 = vpop.f32.mrf.mxu0 }
 0x870   :  { %v1685_v5 = vadd.f32 %v2649_v35, %v1684_v59  ;;  %v1645_v63 = vadd.f32 %v2655_v41, %v1644_v57 }
 0x871   :  { %v2324_v60 = vpop.f32.mrf.mxu1  ;;  %v2332_v4 = vpop.f32.mrf.mxu0 }
 0x872   :  { %v1950_v62 = vmul.f32 -1.442695, %v1685_v5 }
 0x873   :  { %v1647_v7 = vpop.f32.mrf.mxu1  ;;  %v1687_v17 = vpop.f32.mrf.mxu0 }
 0x874   :  { %2480 = vpow2.f32 %v1950_v62 }
 0x875   :  { %v2325_v12 = vpop.f32.mrf.mxu1  ;;  %v2333_v28 = vpop.f32.mrf.mxu0  ;;  %2482 = vtanh.f32 %v1645_v63 }
 0x877   :  { %v2344_v1 = vpop.f32.mrf.mxu1 }
 0x878   :  { %v1821_v2 = vadd.f32 %v2344_v1, %v1951_v61 }
 0x879   :  { %v2477_v3 = vpop.eup %2476  ;;  %v1815_v6 = vpop.f32.mrf.mxu1 }
 0x87a   :  { %v2479_v14 = vpop.eup %2478  ;;  %v1693_v9 = vadd.f32 1.0, %v2477_v3  ;;  %1855 = vst [vmem:[%s2984_s7 + $0x8] sm:$0xff] %v1821_v2  ;;  %v1816_v35 = vadd.f32 %v1951_v61, %v1815_v6 }
 0x87b   :  { %v1699_v10 = vadd.f32 1.0, %v2479_v14  ;;  %v2347_v11 = vpop.f32.mrf.mxu1 }
 0x87c   :  { %2484 = vrcp.f32 %v1693_v9  ;;  %1854 = vst [vmem:[%s2984_s7] sm:$0xff] %v1816_v35  ;;  %v1831_v41 = vadd.f32 %v2347_v11, %v1951_v61 }
 0x87d   :  { %2486 = vrcp.f32 %v1699_v10  ;;  %v1825_v13 = vpop.f32.mrf.mxu1 }
 0x87e   :  { %1857 = vst [vmem:[%s2984_s7 + $0x18] sm:$0xff] %v1831_v41  ;;  %v1826_v18 = vadd.f32 %v1951_v61, %v1825_v13 }
 0x87f   :  { %v2350_v19 = vpop.f32.mrf.mxu1 }
 0x880   :  { %1856 = vst [vmem:[%s2984_s7 + $0x10] sm:$0xff] %v1826_v18  ;;  %v1841_v20 = vadd.f32 %v2350_v19, %v1951_v61 }
 0x881   :  { %v1835_v21 = vpop.f32.mrf.mxu1  ;;  %v2481_v24 = vpop.eup %2480 }
 0x882   :  { %1859 = vst [vmem:[%s2984_s7 + $0x28] sm:$0xff] %v1841_v20  ;;  %v1836_v23 = vadd.f32 %v1951_v61, %v1835_v21  ;;  %v2483_v25 = vpop.eup %2482  ;;  %v1705_v30 = vadd.f32 1.0, %v2481_v24 }
 0x884   :  { %1858 = vst [vmem:[%s2984_s7 + $0x20] sm:$0xff] %v1836_v23  ;;  %2488 = vrcp.f32 %v1705_v30 }
 0x889   :  { %v2485_v26 = vpop.eup %2484 }
 0x88a   :  { %v2487_v27 = vpop.eup %2486  ;;  %v1710_v29 = vmul.f32 %v2485_v26, %v2483_v25 }
 0x88b   :  { %v1709_v31 = vmul.f32 %v2487_v27, %v2898_v40 }
 0x88d   :  { %v1711_v32 = vadd.f32 %v1710_v29, %v1709_v31 }
 0x88f   :  { %2490 = vtanh.f32 %v1711_v32 }
 0x891   :  { %v2489_v34 = vpop.eup %2488 }
 0x89c   :  { %v2491_v36 = vpop.eup %2490 }
 0x89d   :  { %v1713_v37 = vmul.f32 %v2491_v36, %v2489_v34 }
 0x89f   :  { %2352 = vmatmul.mubr.msk.f32.gmra.mxu1 %vm174_vm2, %v1713_v37 }
 0x95f   :  { %v2353_v38 = vpop.f32.mrf.mxu1 }
 0x960   :  { %v1851_v39 = vadd.f32 %v2353_v38, %v1951_v61 }
 0x961   :  { %v1845_v42 = vpop.f32.mrf.mxu1 }
 0x962   :  { %1861 = vst [vmem:[%s2984_s7 + $0x38] sm:$0xff] %v1851_v39  ;;  %v1846_v43 = vadd.f32 %v1951_v61, %v1845_v42 }
 0x964   :  { %1860 = vst [vmem:[%s2984_s7 + $0x30] sm:$0xff] %v1846_v43 }

</bundles_post_ra>
